<compile_context>
chip_gen: v5e
topology: v5e:2x2
jax: 0.10.0
libtpu: 0.0.40
codegen_flags: <defaults>
</compile_context>

<pallas_src>
import functools

import jax
import jax.numpy as jnp
from jax.experimental import pallas as pl
from jax.experimental.pallas import tpu as pltpu

FC1 = 400
FC2 = 300
RATIO_HIDDEN = 32
LN_EPS = 1e-5


def actor_kernel(
    state_ref, cs_ref, ratio_ref,
    w1_ref, wcs_ref, w2s_ref, wmu_ref, wr2_ref,
    vec400_ref, vec300_ref, vec32_ref, veca_ref,
    out_ref,
):
    f32 = jnp.float32

    # Unpack packed parameter slabs (static slices).
    b1,  g1,  be1  = vec400_ref[0:1, :], vec400_ref[1:2, :], vec400_ref[2:3, :]
    bcs, gcs, becs = vec400_ref[3:4, :], vec400_ref[4:5, :], vec400_ref[5:6, :]
    b2,  g2,  be2  = vec300_ref[0:1, :], vec300_ref[1:2, :], vec300_ref[2:3, :]
    bc2, gc2, bec2 = vec300_ref[3:4, :], vec300_ref[4:5, :], vec300_ref[5:6, :]
    wr1_row, br1 = vec32_ref[0:1, :], vec32_ref[1:2, :]
    bmu, br2 = veca_ref[0:1, :], veca_ref[1:2, :]

    def lin(x, w, b):
        # Weights arrive as bf16 (halved HBM traffic); upcast and accumulate in f32.
        return jnp.dot(x, w.astype(f32), preferred_element_type=f32) + b

    def ln_relu(x, g, b):
        # Fused LayerNorm: sum(x) and sum(x*x) are independent cross-lane reductions
        # (vs. the serially dependent mean -> mean((x-mu)^2) chain), and
        # rsqrt(var+eps)*gamma is folded into a single scale.
        inv_n = 1.0 / x.shape[-1]
        mu = jnp.sum(x, axis=-1, keepdims=True) * inv_n
        ms = jnp.sum(x * x, axis=-1, keepdims=True) * inv_n
        scale = jax.lax.rsqrt(ms - mu * mu + LN_EPS) * g
        return jnp.maximum((x - mu) * scale + b, 0.0)

    # state branch
    x = ln_relu(lin(state_ref[...], w1_ref[...], b1), g1, be1)
    x = ln_relu(lin(x, w2s_ref[0], b2), g2, be2)

    # cs branch
    c = ln_relu(lin(cs_ref[...], wcs_ref[...], bcs), gcs, becs)
    c = ln_relu(lin(c, w2s_ref[1], bc2), gc2, bec2)

    x = x + c

    # ratio branch: first layer has K=1 -> outer product -> plain VPU broadcast.
    y = jnp.maximum(ratio_ref[...] * wr1_row + br1, 0.0)
    y = jnp.maximum(jnp.dot(y, wr2_ref[...], preferred_element_type=f32) + br2, 0.0)

    out_ref[...] = jnp.tanh(lin(x, wmu_ref[...], bmu) + y)


@functools.partial(jax.jit, static_argnames=("n_actions",))
def actor_forward(state, cs, ratio, params, n_actions):
    batch, input_dim = state.shape
    w1, wcs, w2s, wmu, wr2, vec400, vec300, vec32, veca = params

    # Batch tiling: single block for small batches; tiles of 128 rows for large
    # batches (weights keep constant block indices, so they are DMA'd once per call
    # and stay VMEM-resident across the batch grid).
    if batch > 128 and batch % 128 == 0:
        bm = 128
    else:
        bm = batch
    grid = (batch // bm,)

    batch_map = lambda i: (i, 0)
    const2 = lambda i: (0, 0)
    const3 = lambda i: (0, 0, 0)
    full2 = lambda a: pl.BlockSpec(a.shape, const2)

    in_specs = [
        pl.BlockSpec((bm, input_dim), batch_map),
        pl.BlockSpec((bm, cs.shape[1]), batch_map),
        pl.BlockSpec((bm, 1), batch_map),
        full2(w1),
        full2(wcs),
        pl.BlockSpec(w2s.shape, const3),
        full2(wmu),
        full2(wr2),
        full2(vec400),
        full2(vec300),
        full2(vec32),
        full2(veca),
    ]
    out_specs = pl.BlockSpec((bm, n_actions), batch_map)

    return pl.pallas_call(
        actor_kernel,
        out_shape=jax.ShapeDtypeStruct((batch, n_actions), jnp.float32),
        grid_spec=pltpu.PrefetchScalarGridSpec(
            num_scalar_prefetch=0,
            grid=grid,
            in_specs=in_specs,
            out_specs=out_specs,
        ),
        compiler_params=pltpu.CompilerParams(
            dimension_semantics=("parallel",),
        ),
    )(state, cs, ratio, w1, wcs, w2s, wmu, wr2, vec400, vec300, vec32, veca)


def init_params(key, input_dim, n_actions):
    """Deterministic init mirroring the PyTorch module's __init__ (shapes only).

    Packed layout (9 arrays):
      w1   : (input_dim, 400)  bf16         fc1 weight (transposed)
      wcs  : (7, 400)          bf16         cs weight (transposed)
      w2s  : (2, 400, 300)     bf16         [fc2, cs2] weights (transposed, stacked)
      wmu  : (300, n_actions)  bf16         mu weight (transposed)
      wr2  : (32, n_actions)   f32          ratio_dis2 weight (transposed)
      vec400: (6, 400) f32  = [fc1.b, bn1.g, bn1.b, cs.b, cs_bn1.g, cs_bn1.b]
      vec300: (6, 300) f32  = [fc2.b, bn2.g, bn2.b, cs2.b, cs_bn2.g, cs_bn2.b]
      vec32 : (2, 32)  f32  = [ratio_dis.w_row, ratio_dis.b]
      vecA  : (2, A)   f32  = [mu.b, ratio_dis2.b]
    """
    ks = jax.random.split(key, 14)

    def u(k, shape, lim):
        return jax.random.uniform(k, shape, jnp.float32, minval=-lim, maxval=lim)

    nf1 = 1.0 / float(FC1) ** 0.5       # 1/sqrt(fc1.weight.size(0)) == 1/sqrt(400)
    nf2 = 1.0 / float(FC2) ** 0.5       # 1/sqrt(300)
    nmu = 0.003
    nr1 = 1.0                            # PyTorch default ~ U(-1/sqrt(fan_in)) with fan_in=1
    nr2 = 1.0 / float(RATIO_HIDDEN) ** 0.5

    ones400 = jnp.ones((1, FC1), jnp.float32)
    zeros400 = jnp.zeros((1, FC1), jnp.float32)
    ones300 = jnp.ones((1, FC2), jnp.float32)
    zeros300 = jnp.zeros((1, FC2), jnp.float32)

    w1 = u(ks[0], (input_dim, FC1), nf1)
    b1 = u(ks[1], (1, FC1), nf1)
    w2 = u(ks[2], (FC1, FC2), nf2)
    b2 = u(ks[3], (1, FC2), nf2)
    wcs = u(ks[4], (7, FC1), nf1)
    bcs = u(ks[5], (1, FC1), nf1)
    wc2 = u(ks[6], (FC1, FC2), nf2)
    bc2 = u(ks[7], (1, FC2), nf2)
    wmu = u(ks[8], (FC2, n_actions), nmu)
    bmu = u(ks[9], (1, n_actions), nmu)
    wr1 = u(ks[10], (1, RATIO_HIDDEN), nr1)
    br1 = u(ks[11], (1, RATIO_HIDDEN), nr1)
    wr2 = u(ks[12], (RATIO_HIDDEN, n_actions), nr2)
    br2 = u(ks[13], (1, n_actions), nr2)

    bf16 = jnp.bfloat16
    return (
        w1.astype(bf16),
        wcs.astype(bf16),
        jnp.stack([w2, wc2], axis=0).astype(bf16),
        wmu.astype(bf16),
        wr2,
        jnp.concatenate([b1, ones400, zeros400, bcs, ones400, zeros400], axis=0),
        jnp.concatenate([b2, ones300, zeros300, bc2, ones300, zeros300], axis=0),
        jnp.concatenate([wr1, br1], axis=0),
        jnp.concatenate([bmu, br2], axis=0),
    )


def reference_forward(state, cs, ratio, params):
    """Pure-JAX f32 reference with standard two-pass LayerNorm, using the same
    (bf16-rounded) weight values as the kernel."""
    w1, wcs, w2s, wmu, wr2, vec400, vec300, vec32, veca = params
    f32 = jnp.float32
    w1, wcs, wmu = w1.astype(f32), wcs.astype(f32), wmu.astype(f32)
    w2, wc2 = w2s[0].astype(f32), w2s[1].astype(f32)
    b1, g1, be1, bcs, gcs, becs = (vec400[i:i + 1] for i in range(6))
    b2, g2, be2, bc2, gc2, bec2 = (vec300[i:i + 1] for i in range(6))
    wr1, br1 = vec32[0:1], vec32[1:2]
    bmu, br2 = veca[0:1], veca[1:2]

    def ln(x, g, b):
        mu = jnp.mean(x, -1, keepdims=True)
        var = jnp.mean((x - mu) ** 2, -1, keepdims=True)
        return (x - mu) / jnp.sqrt(var + LN_EPS) * g + b

    x = jnp.maximum(ln(state @ w1 + b1, g1, be1), 0.0)
    x = jnp.maximum(ln(x @ w2 + b2, g2, be2), 0.0)
    c = jnp.maximum(ln(cs @ wcs + bcs, gcs, becs), 0.0)
    c = jnp.maximum(ln(c @ wc2 + bc2, gc2, bec2), 0.0)
    x = x + c
    y = jnp.maximum(ratio @ wr1 + br1, 0.0)
    y = jnp.maximum(y @ wr2 + br2, 0.0)
    return jnp.tanh(x @ wmu + bmu + y)


if __name__ == "__main__":
    key = jax.random.PRNGKey(0)
    k_state, k_cs, k_ratio, k_params = jax.random.split(key, 4)

    batch = 2
    input_dim = 32          # *input_dims
    n_actions = 4

    state = jax.random.normal(k_state, (batch, input_dim), jnp.float32)
    cs = jax.random.normal(k_cs, (batch, 7), jnp.float32)
    ratio = jax.random.normal(k_ratio, (batch, 1), jnp.float32)

    params = init_params(k_params, input_dim, n_actions)

    out = actor_forward(state, cs, ratio, params, n_actions)
    out = jax.block_until_ready(out)

    ref = reference_forward(state, cs, ratio, params)
    assert out.shape == (batch, n_actions)
    # Fused-variance LayerNorm (E[x^2]-mu^2) differs from the two-pass reference by
    # a few f32 ulps; weights are identical bf16-rounded values in both paths.
    assert jnp.allclose(out, ref, atol=1e-4, rtol=1e-4), "mismatch vs JAX reference"

    print("KERNEL_OK")
</pallas_src>

<mosaic_0001>
module attributes {stable_mosaic.version = 11 : i64} {
  func.func @actor_kernel(%arg0: i32, %arg1: memref<2x32xf32, #tpu.memory_space<vmem>>, %arg2: memref<2x7xf32, #tpu.memory_space<vmem>>, %arg3: memref<2x1xf32, #tpu.memory_space<vmem>>, %arg4: memref<32x400xbf16, #tpu.memory_space<vmem>>, %arg5: memref<7x400xbf16, #tpu.memory_space<vmem>>, %arg6: memref<2x400x300xbf16, #tpu.memory_space<vmem>>, %arg7: memref<300x4xbf16, #tpu.memory_space<vmem>>, %arg8: memref<32x4xf32, #tpu.memory_space<vmem>>, %arg9: memref<6x400xf32, #tpu.memory_space<vmem>>, %arg10: memref<6x300xf32, #tpu.memory_space<vmem>>, %arg11: memref<2x32xf32, #tpu.memory_space<vmem>>, %arg12: memref<2x4xf32, #tpu.memory_space<vmem>>, %arg13: memref<2x4xf32, #tpu.memory_space<vmem>>) attributes {dimension_semantics = [#tpu.dimension_semantics<parallel>], iteration_bounds = array<i64: 1>, scalar_prefetch = 0 : i64, scratch_operands = 0 : i64, tpu.core_type = #tpu.core_type<tc>, window_params = [{transform_indices = @transform_0, window_bounds = array<i64: 2, 32>}, {transform_indices = @transform_1, window_bounds = array<i64: 2, 7>}, {transform_indices = @transform_2, window_bounds = array<i64: 2, 1>}, {pipeline_mode = #tpu.pipeline_mode<synchronous>, transform_indices = @transform_3, window_bounds = array<i64: 32, 400>}, {pipeline_mode = #tpu.pipeline_mode<synchronous>, transform_indices = @transform_4, window_bounds = array<i64: 7, 400>}, {pipeline_mode = #tpu.pipeline_mode<synchronous>, transform_indices = @transform_5, window_bounds = array<i64: 2, 400, 300>}, {pipeline_mode = #tpu.pipeline_mode<synchronous>, transform_indices = @transform_6, window_bounds = array<i64: 300, 4>}, {pipeline_mode = #tpu.pipeline_mode<synchronous>, transform_indices = @transform_7, window_bounds = array<i64: 32, 4>}, {pipeline_mode = #tpu.pipeline_mode<synchronous>, transform_indices = @transform_8, window_bounds = array<i64: 6, 400>}, {pipeline_mode = #tpu.pipeline_mode<synchronous>, transform_indices = @transform_9, window_bounds = array<i64: 6, 300>}, {pipeline_mode = #tpu.pipeline_mode<synchronous>, transform_indices = @transform_10, window_bounds = array<i64: 2, 32>}, {pipeline_mode = #tpu.pipeline_mode<synchronous>, transform_indices = @transform_11, window_bounds = array<i64: 2, 4>}, {transform_indices = @transform_12, window_bounds = array<i64: 2, 4>}]} {
    %c0 = arith.constant 0 : index
    %c0_0 = arith.constant 0 : index
    %0 = vector.load %arg9[%c0, %c0_0] : memref<6x400xf32, #tpu.memory_space<vmem>>, vector<1x400xf32>
    %c1 = arith.constant 1 : index
    %c0_1 = arith.constant 0 : index
    %1 = vector.load %arg9[%c1, %c0_1] : memref<6x400xf32, #tpu.memory_space<vmem>>, vector<1x400xf32>
    %c2 = arith.constant 2 : index
    %c0_2 = arith.constant 0 : index
    %2 = vector.load %arg9[%c2, %c0_2] : memref<6x400xf32, #tpu.memory_space<vmem>>, vector<1x400xf32>
    %c3 = arith.constant 3 : index
    %c0_3 = arith.constant 0 : index
    %3 = vector.load %arg9[%c3, %c0_3] : memref<6x400xf32, #tpu.memory_space<vmem>>, vector<1x400xf32>
    %c4 = arith.constant 4 : index
    %c0_4 = arith.constant 0 : index
    %4 = vector.load %arg9[%c4, %c0_4] : memref<6x400xf32, #tpu.memory_space<vmem>>, vector<1x400xf32>
    %c5 = arith.constant 5 : index
    %c0_5 = arith.constant 0 : index
    %5 = vector.load %arg9[%c5, %c0_5] : memref<6x400xf32, #tpu.memory_space<vmem>>, vector<1x400xf32>
    %c0_6 = arith.constant 0 : index
    %c0_7 = arith.constant 0 : index
    %6 = vector.load %arg10[%c0_6, %c0_7] : memref<6x300xf32, #tpu.memory_space<vmem>>, vector<1x300xf32>
    %c1_8 = arith.constant 1 : index
    %c0_9 = arith.constant 0 : index
    %7 = vector.load %arg10[%c1_8, %c0_9] : memref<6x300xf32, #tpu.memory_space<vmem>>, vector<1x300xf32>
    %c2_10 = arith.constant 2 : index
    %c0_11 = arith.constant 0 : index
    %8 = vector.load %arg10[%c2_10, %c0_11] : memref<6x300xf32, #tpu.memory_space<vmem>>, vector<1x300xf32>
    %c3_12 = arith.constant 3 : index
    %c0_13 = arith.constant 0 : index
    %9 = vector.load %arg10[%c3_12, %c0_13] : memref<6x300xf32, #tpu.memory_space<vmem>>, vector<1x300xf32>
    %c4_14 = arith.constant 4 : index
    %c0_15 = arith.constant 0 : index
    %10 = vector.load %arg10[%c4_14, %c0_15] : memref<6x300xf32, #tpu.memory_space<vmem>>, vector<1x300xf32>
    %c5_16 = arith.constant 5 : index
    %c0_17 = arith.constant 0 : index
    %11 = vector.load %arg10[%c5_16, %c0_17] : memref<6x300xf32, #tpu.memory_space<vmem>>, vector<1x300xf32>
    %c0_18 = arith.constant 0 : index
    %c0_19 = arith.constant 0 : index
    %12 = vector.load %arg11[%c0_18, %c0_19] : memref<2x32xf32, #tpu.memory_space<vmem>>, vector<1x32xf32>
    %c1_20 = arith.constant 1 : index
    %c0_21 = arith.constant 0 : index
    %13 = vector.load %arg11[%c1_20, %c0_21] : memref<2x32xf32, #tpu.memory_space<vmem>>, vector<1x32xf32>
    %c0_22 = arith.constant 0 : index
    %c0_23 = arith.constant 0 : index
    %14 = vector.load %arg12[%c0_22, %c0_23] : memref<2x4xf32, #tpu.memory_space<vmem>>, vector<1x4xf32>
    %c1_24 = arith.constant 1 : index
    %c0_25 = arith.constant 0 : index
    %15 = vector.load %arg12[%c1_24, %c0_25] : memref<2x4xf32, #tpu.memory_space<vmem>>, vector<1x4xf32>
    %c0_26 = arith.constant 0 : index
    %c0_27 = arith.constant 0 : index
    %16 = vector.load %arg1[%c0_26, %c0_27] : memref<2x32xf32, #tpu.memory_space<vmem>>, vector<2x32xf32>
    %c0_28 = arith.constant 0 : index
    %c0_29 = arith.constant 0 : index
    %17 = vector.load %arg4[%c0_28, %c0_29] : memref<32x400xbf16, #tpu.memory_space<vmem>>, vector<32x400xbf16>
    %18 = arith.extf %17 : vector<32x400xbf16> to vector<32x400xf32>
    %cst = arith.constant dense<0.000000e+00> : vector<2x400xf32>
    %19 = tpu.matmul %16, %18, %cst {dimension_numbers = #tpu.dot_dimension_numbers<[1], [0], [0], [1], [0, 0, 1, 1], [], []>} : vector<2x32xf32>, vector<32x400xf32>, vector<2x400xf32> -> vector<2x400xf32>
    %20 = vector.broadcast %0 : vector<1x400xf32> to vector<2x400xf32>
    %21 = arith.addf %19, %20 : vector<2x400xf32>
    %cst_30 = arith.constant dense<0.000000e+00> : vector<2xf32>
    %22 = vector.multi_reduction <add>, %21, %cst_30 [1] : vector<2x400xf32> to vector<2xf32>
    %23 = vector.shape_cast %22 : vector<2xf32> to vector<2x1xf32>
    %cst_31 = arith.constant 2.500000e-03 : f32
    %24 = vector.broadcast %cst_31 : f32 to vector<2x1xf32>
    %25 = arith.mulf %23, %24 : vector<2x1xf32>
    %26 = arith.mulf %21, %21 : vector<2x400xf32>
    %cst_32 = arith.constant dense<0.000000e+00> : vector<2xf32>
    %27 = vector.multi_reduction <add>, %26, %cst_32 [1] : vector<2x400xf32> to vector<2xf32>
    %28 = vector.shape_cast %27 : vector<2xf32> to vector<2x1xf32>
    %cst_33 = arith.constant 2.500000e-03 : f32
    %29 = vector.broadcast %cst_33 : f32 to vector<2x1xf32>
    %30 = arith.mulf %28, %29 : vector<2x1xf32>
    %31 = arith.mulf %25, %25 : vector<2x1xf32>
    %32 = arith.subf %30, %31 : vector<2x1xf32>
    %cst_34 = arith.constant 9.99999974E-6 : f32
    %33 = vector.broadcast %cst_34 : f32 to vector<2x1xf32>
    %34 = arith.addf %32, %33 : vector<2x1xf32>
    %35 = math.rsqrt %34 : vector<2x1xf32>
    %36 = vector.broadcast %35 : vector<2x1xf32> to vector<2x400xf32>
    %37 = vector.broadcast %1 : vector<1x400xf32> to vector<2x400xf32>
    %38 = arith.mulf %36, %37 : vector<2x400xf32>
    %39 = vector.broadcast %25 : vector<2x1xf32> to vector<2x400xf32>
    %40 = arith.subf %21, %39 : vector<2x400xf32>
    %41 = arith.mulf %40, %38 : vector<2x400xf32>
    %42 = vector.broadcast %2 : vector<1x400xf32> to vector<2x400xf32>
    %43 = arith.addf %41, %42 : vector<2x400xf32>
    %cst_35 = arith.constant 0.000000e+00 : f32
    %44 = vector.broadcast %cst_35 : f32 to vector<2x400xf32>
    %45 = arith.maximumf %43, %44 : vector<2x400xf32>
    %c0_36 = arith.constant 0 : index
    %c0_37 = arith.constant 0 : index
    %c0_38 = arith.constant 0 : index
    %46 = vector.load %arg6[%c0_36, %c0_37, %c0_38] : memref<2x400x300xbf16, #tpu.memory_space<vmem>>, vector<1x400x300xbf16>
    %47 = vector.shape_cast %46 : vector<1x400x300xbf16> to vector<400x300xbf16>
    %48 = arith.extf %47 : vector<400x300xbf16> to vector<400x300xf32>
    %cst_39 = arith.constant dense<0.000000e+00> : vector<2x300xf32>
    %49 = tpu.matmul %45, %48, %cst_39 {dimension_numbers = #tpu.dot_dimension_numbers<[1], [0], [0], [1], [0, 0, 1, 1], [], []>} : vector<2x400xf32>, vector<400x300xf32>, vector<2x300xf32> -> vector<2x300xf32>
    %50 = vector.broadcast %6 : vector<1x300xf32> to vector<2x300xf32>
    %51 = arith.addf %49, %50 : vector<2x300xf32>
    %cst_40 = arith.constant dense<0.000000e+00> : vector<2xf32>
    %52 = vector.multi_reduction <add>, %51, %cst_40 [1] : vector<2x300xf32> to vector<2xf32>
    %53 = vector.shape_cast %52 : vector<2xf32> to vector<2x1xf32>
    %cst_41 = arith.constant 0.00333333341 : f32
    %54 = vector.broadcast %cst_41 : f32 to vector<2x1xf32>
    %55 = arith.mulf %53, %54 : vector<2x1xf32>
    %56 = arith.mulf %51, %51 : vector<2x300xf32>
    %cst_42 = arith.constant dense<0.000000e+00> : vector<2xf32>
    %57 = vector.multi_reduction <add>, %56, %cst_42 [1] : vector<2x300xf32> to vector<2xf32>
    %58 = vector.shape_cast %57 : vector<2xf32> to vector<2x1xf32>
    %cst_43 = arith.constant 0.00333333341 : f32
    %59 = vector.broadcast %cst_43 : f32 to vector<2x1xf32>
    %60 = arith.mulf %58, %59 : vector<2x1xf32>
    %61 = arith.mulf %55, %55 : vector<2x1xf32>
    %62 = arith.subf %60, %61 : vector<2x1xf32>
    %cst_44 = arith.constant 9.99999974E-6 : f32
    %63 = vector.broadcast %cst_44 : f32 to vector<2x1xf32>
    %64 = arith.addf %62, %63 : vector<2x1xf32>
    %65 = math.rsqrt %64 : vector<2x1xf32>
    %66 = vector.broadcast %65 : vector<2x1xf32> to vector<2x300xf32>
    %67 = vector.broadcast %7 : vector<1x300xf32> to vector<2x300xf32>
    %68 = arith.mulf %66, %67 : vector<2x300xf32>
    %69 = vector.broadcast %55 : vector<2x1xf32> to vector<2x300xf32>
    %70 = arith.subf %51, %69 : vector<2x300xf32>
    %71 = arith.mulf %70, %68 : vector<2x300xf32>
    %72 = vector.broadcast %8 : vector<1x300xf32> to vector<2x300xf32>
    %73 = arith.addf %71, %72 : vector<2x300xf32>
    %cst_45 = arith.constant 0.000000e+00 : f32
    %74 = vector.broadcast %cst_45 : f32 to vector<2x300xf32>
    %75 = arith.maximumf %73, %74 : vector<2x300xf32>
    %c0_46 = arith.constant 0 : index
    %c0_47 = arith.constant 0 : index
    %76 = vector.load %arg2[%c0_46, %c0_47] : memref<2x7xf32, #tpu.memory_space<vmem>>, vector<2x7xf32>
    %c0_48 = arith.constant 0 : index
    %c0_49 = arith.constant 0 : index
    %77 = vector.load %arg5[%c0_48, %c0_49] : memref<7x400xbf16, #tpu.memory_space<vmem>>, vector<7x400xbf16>
    %78 = arith.extf %77 : vector<7x400xbf16> to vector<7x400xf32>
    %cst_50 = arith.constant dense<0.000000e+00> : vector<2x400xf32>
    %79 = tpu.matmul %76, %78, %cst_50 {dimension_numbers = #tpu.dot_dimension_numbers<[1], [0], [0], [1], [0, 0, 1, 1], [], []>} : vector<2x7xf32>, vector<7x400xf32>, vector<2x400xf32> -> vector<2x400xf32>
    %80 = vector.broadcast %3 : vector<1x400xf32> to vector<2x400xf32>
    %81 = arith.addf %79, %80 : vector<2x400xf32>
    %cst_51 = arith.constant dense<0.000000e+00> : vector<2xf32>
    %82 = vector.multi_reduction <add>, %81, %cst_51 [1] : vector<2x400xf32> to vector<2xf32>
    %83 = vector.shape_cast %82 : vector<2xf32> to vector<2x1xf32>
    %cst_52 = arith.constant 2.500000e-03 : f32
    %84 = vector.broadcast %cst_52 : f32 to vector<2x1xf32>
    %85 = arith.mulf %83, %84 : vector<2x1xf32>
    %86 = arith.mulf %81, %81 : vector<2x400xf32>
    %cst_53 = arith.constant dense<0.000000e+00> : vector<2xf32>
    %87 = vector.multi_reduction <add>, %86, %cst_53 [1] : vector<2x400xf32> to vector<2xf32>
    %88 = vector.shape_cast %87 : vector<2xf32> to vector<2x1xf32>
    %cst_54 = arith.constant 2.500000e-03 : f32
    %89 = vector.broadcast %cst_54 : f32 to vector<2x1xf32>
    %90 = arith.mulf %88, %89 : vector<2x1xf32>
    %91 = arith.mulf %85, %85 : vector<2x1xf32>
    %92 = arith.subf %90, %91 : vector<2x1xf32>
    %cst_55 = arith.constant 9.99999974E-6 : f32
    %93 = vector.broadcast %cst_55 : f32 to vector<2x1xf32>
    %94 = arith.addf %92, %93 : vector<2x1xf32>
    %95 = math.rsqrt %94 : vector<2x1xf32>
    %96 = vector.broadcast %95 : vector<2x1xf32> to vector<2x400xf32>
    %97 = vector.broadcast %4 : vector<1x400xf32> to vector<2x400xf32>
    %98 = arith.mulf %96, %97 : vector<2x400xf32>
    %99 = vector.broadcast %85 : vector<2x1xf32> to vector<2x400xf32>
    %100 = arith.subf %81, %99 : vector<2x400xf32>
    %101 = arith.mulf %100, %98 : vector<2x400xf32>
    %102 = vector.broadcast %5 : vector<1x400xf32> to vector<2x400xf32>
    %103 = arith.addf %101, %102 : vector<2x400xf32>
    %cst_56 = arith.constant 0.000000e+00 : f32
    %104 = vector.broadcast %cst_56 : f32 to vector<2x400xf32>
    %105 = arith.maximumf %103, %104 : vector<2x400xf32>
    %c1_57 = arith.constant 1 : index
    %c0_58 = arith.constant 0 : index
    %c0_59 = arith.constant 0 : index
    %106 = vector.load %arg6[%c1_57, %c0_58, %c0_59] : memref<2x400x300xbf16, #tpu.memory_space<vmem>>, vector<1x400x300xbf16>
    %107 = vector.shape_cast %106 : vector<1x400x300xbf16> to vector<400x300xbf16>
    %108 = arith.extf %107 : vector<400x300xbf16> to vector<400x300xf32>
    %cst_60 = arith.constant dense<0.000000e+00> : vector<2x300xf32>
    %109 = tpu.matmul %105, %108, %cst_60 {dimension_numbers = #tpu.dot_dimension_numbers<[1], [0], [0], [1], [0, 0, 1, 1], [], []>} : vector<2x400xf32>, vector<400x300xf32>, vector<2x300xf32> -> vector<2x300xf32>
    %110 = vector.broadcast %9 : vector<1x300xf32> to vector<2x300xf32>
    %111 = arith.addf %109, %110 : vector<2x300xf32>
    %cst_61 = arith.constant dense<0.000000e+00> : vector<2xf32>
    %112 = vector.multi_reduction <add>, %111, %cst_61 [1] : vector<2x300xf32> to vector<2xf32>
    %113 = vector.shape_cast %112 : vector<2xf32> to vector<2x1xf32>
    %cst_62 = arith.constant 0.00333333341 : f32
    %114 = vector.broadcast %cst_62 : f32 to vector<2x1xf32>
    %115 = arith.mulf %113, %114 : vector<2x1xf32>
    %116 = arith.mulf %111, %111 : vector<2x300xf32>
    %cst_63 = arith.constant dense<0.000000e+00> : vector<2xf32>
    %117 = vector.multi_reduction <add>, %116, %cst_63 [1] : vector<2x300xf32> to vector<2xf32>
    %118 = vector.shape_cast %117 : vector<2xf32> to vector<2x1xf32>
    %cst_64 = arith.constant 0.00333333341 : f32
    %119 = vector.broadcast %cst_64 : f32 to vector<2x1xf32>
    %120 = arith.mulf %118, %119 : vector<2x1xf32>
    %121 = arith.mulf %115, %115 : vector<2x1xf32>
    %122 = arith.subf %120, %121 : vector<2x1xf32>
    %cst_65 = arith.constant 9.99999974E-6 : f32
    %123 = vector.broadcast %cst_65 : f32 to vector<2x1xf32>
    %124 = arith.addf %122, %123 : vector<2x1xf32>
    %125 = math.rsqrt %124 : vector<2x1xf32>
    %126 = vector.broadcast %125 : vector<2x1xf32> to vector<2x300xf32>
    %127 = vector.broadcast %10 : vector<1x300xf32> to vector<2x300xf32>
    %128 = arith.mulf %126, %127 : vector<2x300xf32>
    %129 = vector.broadcast %115 : vector<2x1xf32> to vector<2x300xf32>
    %130 = arith.subf %111, %129 : vector<2x300xf32>
    %131 = arith.mulf %130, %128 : vector<2x300xf32>
    %132 = vector.broadcast %11 : vector<1x300xf32> to vector<2x300xf32>
    %133 = arith.addf %131, %132 : vector<2x300xf32>
    %cst_66 = arith.constant 0.000000e+00 : f32
    %134 = vector.broadcast %cst_66 : f32 to vector<2x300xf32>
    %135 = arith.maximumf %133, %134 : vector<2x300xf32>
    %136 = arith.addf %75, %135 : vector<2x300xf32>
    %c0_67 = arith.constant 0 : index
    %c0_68 = arith.constant 0 : index
    %137 = vector.load %arg3[%c0_67, %c0_68] : memref<2x1xf32, #tpu.memory_space<vmem>>, vector<2x1xf32>
    %138 = vector.broadcast %137 : vector<2x1xf32> to vector<2x32xf32>
    %139 = vector.broadcast %12 : vector<1x32xf32> to vector<2x32xf32>
    %140 = arith.mulf %138, %139 : vector<2x32xf32>
    %141 = vector.broadcast %13 : vector<1x32xf32> to vector<2x32xf32>
    %142 = arith.addf %140, %141 : vector<2x32xf32>
    %cst_69 = arith.constant 0.000000e+00 : f32
    %143 = vector.broadcast %cst_69 : f32 to vector<2x32xf32>
    %144 = arith.maximumf %142, %143 : vector<2x32xf32>
    %c0_70 = arith.constant 0 : index
    %c0_71 = arith.constant 0 : index
    %145 = vector.load %arg8[%c0_70, %c0_71] : memref<32x4xf32, #tpu.memory_space<vmem>>, vector<32x4xf32>
    %cst_72 = arith.constant dense<0.000000e+00> : vector<2x4xf32>
    %146 = tpu.matmul %144, %145, %cst_72 {dimension_numbers = #tpu.dot_dimension_numbers<[1], [0], [0], [1], [0, 0, 1, 1], [], []>} : vector<2x32xf32>, vector<32x4xf32>, vector<2x4xf32> -> vector<2x4xf32>
    %147 = vector.broadcast %15 : vector<1x4xf32> to vector<2x4xf32>
    %148 = arith.addf %146, %147 : vector<2x4xf32>
    %cst_73 = arith.constant 0.000000e+00 : f32
    %149 = vector.broadcast %cst_73 : f32 to vector<2x4xf32>
    %150 = arith.maximumf %148, %149 : vector<2x4xf32>
    %c0_74 = arith.constant 0 : index
    %c0_75 = arith.constant 0 : index
    %151 = vector.load %arg7[%c0_74, %c0_75] : memref<300x4xbf16, #tpu.memory_space<vmem>>, vector<300x4xbf16>
    %152 = arith.extf %151 : vector<300x4xbf16> to vector<300x4xf32>
    %cst_76 = arith.constant dense<0.000000e+00> : vector<2x4xf32>
    %153 = tpu.matmul %136, %152, %cst_76 {dimension_numbers = #tpu.dot_dimension_numbers<[1], [0], [0], [1], [0, 0, 1, 1], [], []>} : vector<2x300xf32>, vector<300x4xf32>, vector<2x4xf32> -> vector<2x4xf32>
    %154 = vector.broadcast %14 : vector<1x4xf32> to vector<2x4xf32>
    %155 = arith.addf %153, %154 : vector<2x4xf32>
    %156 = arith.addf %155, %150 : vector<2x4xf32>
    %157 = math.tanh %156 : vector<2x4xf32>
    %c0_77 = arith.constant 0 : index
    %c0_78 = arith.constant 0 : index
    %158 = vector.load %arg13[%c0_77, %c0_78] : memref<2x4xf32, #tpu.memory_space<vmem>>, vector<2x4xf32>
    tpu.vector_store %arg13[%c0_77, %c0_78], %157 {strides = array<i32>} : memref<2x4xf32, #tpu.memory_space<vmem>>, vector<2x4xf32>,
    return
  }
  func.func @transform_0(%arg0: i32) -> (i32, i32) {
    %c0_i32 = arith.constant 0 : i32
    %c0_i32_0 = arith.constant 0 : i32
    return %arg0, %c0_i32 : i32, i32
  }
  func.func @transform_1(%arg0: i32) -> (i32, i32) {
    %c0_i32 = arith.constant 0 : i32
    %c0_i32_0 = arith.constant 0 : i32
    return %arg0, %c0_i32 : i32, i32
  }
  func.func @transform_2(%arg0: i32) -> (i32, i32) {
    %c0_i32 = arith.constant 0 : i32
    %c0_i32_0 = arith.constant 0 : i32
    return %arg0, %c0_i32 : i32, i32
  }
  func.func @transform_3(%arg0: i32) -> (i32, i32) {
    %c0_i32 = arith.constant 0 : i32
    %c0_i32_0 = arith.constant 0 : i32
    %c0_i32_1 = arith.constant 0 : i32
    return %c0_i32, %c0_i32_0 : i32, i32
  }
  func.func @transform_4(%arg0: i32) -> (i32, i32) {
    %c0_i32 = arith.constant 0 : i32
    %c0_i32_0 = arith.constant 0 : i32
    %c0_i32_1 = arith.constant 0 : i32
    return %c0_i32, %c0_i32_0 : i32, i32
  }
  func.func @transform_5(%arg0: i32) -> (i32, i32, i32) {
    %c0_i32 = arith.constant 0 : i32
    %c0_i32_0 = arith.constant 0 : i32
    %c0_i32_1 = arith.constant 0 : i32
    %c0_i32_2 = arith.constant 0 : i32
    return %c0_i32, %c0_i32_0, %c0_i32_1 : i32, i32, i32
  }
  func.func @transform_6(%arg0: i32) -> (i32, i32) {
    %c0_i32 = arith.constant 0 : i32
    %c0_i32_0 = arith.constant 0 : i32
    %c0_i32_1 = arith.constant 0 : i32
    return %c0_i32, %c0_i32_0 : i32, i32
  }
  func.func @transform_7(%arg0: i32) -> (i32, i32) {
    %c0_i32 = arith.constant 0 : i32
    %c0_i32_0 = arith.constant 0 : i32
    %c0_i32_1 = arith.constant 0 : i32
    return %c0_i32, %c0_i32_0 : i32, i32
  }
  func.func @transform_8(%arg0: i32) -> (i32, i32) {
    %c0_i32 = arith.constant 0 : i32
    %c0_i32_0 = arith.constant 0 : i32
    %c0_i32_1 = arith.constant 0 : i32
    return %c0_i32, %c0_i32_0 : i32, i32
  }
  func.func @transform_9(%arg0: i32) -> (i32, i32) {
    %c0_i32 = arith.constant 0 : i32
    %c0_i32_0 = arith.constant 0 : i32
    %c0_i32_1 = arith.constant 0 : i32
    return %c0_i32, %c0_i32_0 : i32, i32
  }
  func.func @transform_10(%arg0: i32) -> (i32, i32) {
    %c0_i32 = arith.constant 0 : i32
    %c0_i32_0 = arith.constant 0 : i32
    %c0_i32_1 = arith.constant 0 : i32
    return %c0_i32, %c0_i32_0 : i32, i32
  }
  func.func @transform_11(%arg0: i32) -> (i32, i32) {
    %c0_i32 = arith.constant 0 : i32
    %c0_i32_0 = arith.constant 0 : i32
    %c0_i32_1 = arith.constant 0 : i32
    return %c0_i32, %c0_i32_0 : i32, i32
  }
  func.func @transform_12(%arg0: i32) -> (i32, i32) {
    %c0_i32 = arith.constant 0 : i32
    %c0_i32_0 = arith.constant 0 : i32
    return %arg0, %c0_i32 : i32, i32
  }
}

</mosaic_0001>

<bundles_post_ra>
// kernel: actor_forward.1
= control target key start
LH: loop header
LB: loop body
LE: loop exit
PB: predicated region body
PF: predicated region fallthrough
CT: control target
= control target key end

     0   :  { %17 = vsyncpa [#allocation3], 0  ;;  %s2822_s0 = inlined_call_operand.vmem [shape: f32[2,32], index: 0, kind: input, shape index: {}]   ;;  %s2823_s1 = inlined_call_operand.vmem [shape: f32[2,7], index: 1, kind: input, shape index: {}]   ;;  %s2824_s2 = inlined_call_operand.vmem [shape: f32[2,1], index: 2, kind: input, shape index: {}]   ;;  %s2825_s3 = inlined_call_operand.vmem [shape: bf16[32,400], index: 3, kind: input, shape index: {}]   ;;  %s2826_s4 = inlined_call_operand.vmem [shape: bf16[7,400], index: 4, kind: input, shape index: {}]   ;;  %s2827_s5 = inlined_call_operand.hbm [shape: bf16[2,400,300], index: 5, kind: input, shape index: {}]   ;;  %s2828_s6 = inlined_call_operand.vmem [shape: bf16[300,4], index: 6, kind: input, shape index: {}]   ;;  %s2829_s7 = inlined_call_operand.vmem [shape: f32[32,4], index: 7, kind: input, shape index: {}]   ;;  %s2830_s8 = inlined_call_operand.vmem [shape: f32[6,400], index: 8, kind: input, shape index: {}]   ;;  %s2831_s9 = inlined_call_operand.vmem [shape: f32[6,300], index: 9, kind: input, shape index: {}]   ;;  %s2832_s10 = inlined_call_operand.vmem [shape: f32[2,32], index: 10, kind: input, shape index: {}]   ;;  %s2833_s11 = inlined_call_operand.vmem [shape: f32[2,4], index: 11, kind: input, shape index: {}]   ;;  %s2834_s12 = inlined_call_operand.hbm [shape: f32[2,4], index: 12, kind: output, shape index: {}]  }
   0x1   :  { %18 = vsyncpa [#allocation4], 0  ;;  %s33_s23 = sshll.u32 %s2827_s5, 4  ;;  %s1994_s24 = smov [#allocation2]   ;;  %s34_s23 = int_to_ptr.hbm [resolvable:$true] %s33_s23 }
   0x2   :  { %s35_s25 = sshll.u32 %s1994_s24, 4  ;;  %s1995_s26 = smov 192   ;;  %s36_s25 = int_to_ptr.vmem [resolvable:$true] %s35_s25 }
   0x3   :  { %s1996_s27 = smov 12  }
   0x4   :  { %41 = dma.hbm_to_vmem [thread:$0]  %s34_s23, 19200, %s36_s25, [#allocation3], %s1995_s26, %s1995_s26, %s1996_s27  }
   0x5   :  { %1990 = dma.done.wait [#allocation3], 19200  }
   0x6   :  { %1991 = vsyncadd [#allocation3], 4294948096  ;;  %v91_v0 = vld [vmem:[%s2825_s3 + $0x30] sm:$0xff]  ;;  %v89_v1 = vld [vmem:[%s2825_s3 + $0x20] sm:$0xff]  ;;  %vm118_vm0 = vcmask 261120   ;;  %vm202_vm1 = vcmask 1041408  }
   0x7   :  { %v87_v2 = vld [vmem:[%s2825_s3 + $0x10] sm:$0xff]  ;;  %v106_v3 = vunpack.c.h.bf16 %v91_v0  ;;  %v102_v4 = vunpack.c.h.bf16 %v89_v1  ;;  %v105_v5 = vunpack.c.l.bf16 %v91_v0  ;;  %v85_v6 = vld [vmem:[%s2825_s3] sm:$0xff]  ;;  %v101_v7 = vunpack.c.l.bf16 %v89_v1  ;;  %v92_v9 = vld [vmem:[%s2825_s3 + $0x38] sm:$0xff]  ;;  %s1998_s5 = smov [#allocation5]  }
   0x8   :  { %v98_v8 = vunpack.c.h.bf16 %v87_v2  ;;  %v97_v10 = vunpack.c.l.bf16 %v87_v2  ;;  %v94_v11 = vunpack.c.h.bf16 %v85_v6  ;;  %v93_v12 = vunpack.c.l.bf16 %v85_v6  ;;  %v90_v13 = vld [vmem:[%s2825_s3 + $0x28] sm:$0xff]  ;;  %v84_v14 = vld [vmem:[%s2822_s0] sm:$0x3]  ;;  %v88_v17 = vld [vmem:[%s2825_s3 + $0x18] sm:$0xff] }
   0x9   :  { %154 = vmatpush.msra.mxu2 %v106_v3  ;;  %134 = vmatpush.msra.mxu0 %v105_v5  ;;  %v107_v15 = vunpack.c.l.bf16 %v92_v9  ;;  %v108_v16 = vunpack.c.h.bf16 %v92_v9  ;;  %v103_v18 = vunpack.c.l.bf16 %v90_v13  ;;  %v104_v19 = vunpack.c.h.bf16 %v90_v13  ;;  %v86_v20 = vld [vmem:[%s2825_s3 + $0x8] sm:$0xff]  ;;  %v2098_v25 = vld [vmem:[#allocation2 + $0xb4] sm:$0xff]  ;;  %v2102_v27 = vld [vmem:[#allocation2 + $0x9c] sm:$0xff] }
   0xa   :  { %v99_v21 = vunpack.c.l.bf16 %v88_v17  ;;  %v100_v22 = vunpack.c.h.bf16 %v88_v17  ;;  %v95_v23 = vunpack.c.l.bf16 %v86_v20  ;;  %v96_v24 = vunpack.c.h.bf16 %v86_v20  ;;  %v2100_v26 = vld [vmem:[#allocation2 + $0xa8] sm:$0xff]  ;;  %v2106_v30 = vld [vmem:[#allocation2 + $0x174] sm:$0xff]  ;;  %v2115_v36 = vld [vmem:[#allocation2 + $0x15c] sm:$0xff] }
   0xb   :  { %155 = vmatpush.msra.mxu2 %v102_v4  ;;  %135 = vmatpush.msra.mxu0 %v101_v7  ;;  %v424_v28 = vunpack.c.l.bf16 %v2098_v25  ;;  %v421_v29 = vunpack.c.l.bf16 %v2100_v26  ;;  %v2108_v31 = vld [vmem:[#allocation2 + $0x90] sm:$0xff]  ;;  %v472_v32 = vunpack.c.l.bf16 %v2106_v30  ;;  %v2111_v33 = vld [vmem:[#allocation2 + $0x168] sm:$0xff]  ;;  %v418_v34 = vunpack.c.l.bf16 %v2102_v27  ;;  %v2128_v44 = vld [vmem:[#allocation2 + $0x78] sm:$0xff] }
   0xc   :  { %v469_v35 = vunpack.c.l.bf16 %v2111_v33  ;;  %v2117_v37 = vld [vmem:[#allocation2 + $0x150] sm:$0xff]  ;;  %v2122_v40 = vld [vmem:[#allocation2 + $0x84] sm:$0xff]  ;;  %v466_v41 = vunpack.c.l.bf16 %v2115_v36  ;;  %v415_v42 = vunpack.c.l.bf16 %v2108_v31  ;;  %v2132_v49 = vld [vmem:[#allocation2 + $0x138] sm:$0xff]  ;;  %v409_v53 = vunpack.c.l.bf16 %v2128_v44 }
   0xd   :  { %156 = vmatpush.msra.mxu2 %v98_v8  ;;  %136 = vmatpush.msra.mxu0 %v97_v10  ;;  %v58_v38 = vld [vmem:[%s2830_s8] ss:$8 sm:$0xf]  ;;  %v463_v45 = vunpack.c.l.bf16 %v2117_v37  ;;  %v412_v48 = vunpack.c.l.bf16 %v2122_v40  ;;  %v457_v56 = vunpack.c.l.bf16 %v2132_v49  ;;  %vm208_vm2 = vcmask 123904  }
   0xe   :  { %560 = vmatpush.msra.mxu1 %v472_v32  ;;  %v2126_v43 = vld [vmem:[#allocation2 + $0x144] sm:$0xff]  ;;  %v110_v46 = vperm.slane %v58_v38, 0  ;;  %v111_v47 = vperm.slane %v58_v38, 1  ;;  %v2134_v51 = vld [vmem:[#allocation2 + $0x6c] sm:$0xff]  ;;  %v113_v59 = vperm.slane %v58_v38, 3  ;;  %v2148_v62 = vld [vmem:[#allocation2 + $0x54] sm:$0xff] }
   0xf   :  { %157 = vmatpush.msra.mxu2 %v94_v11  ;;  %137 = vmatpush.msra.mxu0 %v93_v12  ;;  %v460_v52 = vunpack.c.l.bf16 %v2126_v43  ;;  %v2138_v54 = vld [vmem:[#allocation2 + $0x12c] sm:$0xff]  ;;  %v2140_v55 = vld [vmem:[#allocation2 + $0x60] sm:$0xff]  ;;  %v406_v60 = vunpack.c.l.bf16 %v2134_v51  ;;  %v112_v0 = vperm.slane %v58_v38, 2  ;;  %v400_v6 = vunpack.c.l.bf16 %v2148_v62 }
  0x10   :  { %1812 = vmatmul.msk.f32.vlgmr.msra.gmra.mxu2 %vm118_vm0, %v84_v14  ;;  %1811 = vmatmul.msk.f32.vlgmr.msra.gmra.mxu0 %vm118_vm0, %v84_v14  ;;  %v454_v63 = vunpack.c.l.bf16 %v2138_v54  ;;  %v403_v1 = vunpack.c.l.bf16 %v2140_v55  ;;  %v2152_v2 = vld [vmem:[#allocation2 + $0x48] sm:$0xff]  ;;  %v2161_v8 = vld [vmem:[#allocation2 + $0x3c] sm:$0xff]  ;;  %vm536_vm6 = vcmask 130048   ;;  %vm862_vm7 = vcmask 1046528  }
  0x11   :  { %174 = vmatpush.msrb.mxu2 %v107_v15  ;;  %194 = vmatpush.msrb.mxu0 %v108_v16  ;;  %v397_v12 = vunpack.c.l.bf16 %v2152_v2  ;;  %v394_v17 = vunpack.c.l.bf16 %v2161_v8  ;;  %vm858_vm8 = vcmask 56320   ;;  %vm783_vm9 = vcmask 353280  }
  0x12   :  { %561 = vmatpush.msra.mxu1 %v469_v35  ;;  %v2185_v35 = vld [vmem:[#allocation2 + $0x120] sm:$0xff]  ;;  %vm1716_vm13 = vcmask 1043456  }
  0x13   :  { %175 = vmatpush.msrb.mxu2 %v103_v18  ;;  %195 = vmatpush.msrb.mxu0 %v104_v19 }
  0x14   :  { %562 = vmatpush.msra.mxu1 %v466_v41  ;;  %v2189_v41 = vld [vmem:[#allocation2 + $0x24] sm:$0xff] }
  0x15   :  { %176 = vmatpush.msrb.mxu2 %v99_v21  ;;  %196 = vmatpush.msrb.mxu0 %v100_v22 }
  0x16   :  { %563 = vmatpush.msra.mxu1 %v463_v45  ;;  %v388_v45 = vunpack.c.l.bf16 %v2189_v41 }
  0x17   :  { %177 = vmatpush.msrb.mxu2 %v95_v23  ;;  %197 = vmatpush.msrb.mxu0 %v96_v24 }
  0x18   :  { %1813 = vmatmul.msk.f32.vlgmr.msrb.gmra.mxu2 %vm118_vm0, %v84_v14  ;;  %1814 = vmatmul.msk.f32.vlgmr.msrb.gmra.mxu0 %vm118_vm0, %v84_v14 }
  0x19   :  { %540 = vmatpush.msra.mxu0 %v424_v28  ;;  %564 = vmatpush.msra.mxu1 %v460_v52 }
  0x1b   :  { %541 = vmatpush.msra.mxu0 %v421_v29  ;;  %565 = vmatpush.msra.mxu1 %v457_v56  ;;  %v2203_v56 = vld [vmem:[#allocation2 + $0xfc] sm:$0xff] }
  0x1d   :  { %542 = vmatpush.msra.mxu0 %v418_v34  ;;  %566 = vmatpush.msra.mxu1 %v454_v63  ;;  %v2183_v34 = vld [vmem:[#allocation2 + $0x30] sm:$0xff]  ;;  %v442_v63 = vunpack.c.l.bf16 %v2203_v56 }
  0x1e   :  { %v391_v38 = vunpack.c.l.bf16 %v2183_v34 }
  0x1f   :  { %543 = vmatpush.msra.mxu0 %v415_v42  ;;  %v2191_v42 = vld [vmem:[#allocation2 + $0x114] sm:$0xff] }
  0x21   :  { %544 = vmatpush.msra.mxu0 %v412_v48  ;;  %v2197_v48 = vld [vmem:[#allocation2 + $0x108] sm:$0xff] }
  0x23   :  { %545 = vmatpush.msra.mxu0 %v409_v53  ;;  %v445_v53 = vunpack.c.l.bf16 %v2197_v48 }
  0x25   :  { %546 = vmatpush.msra.mxu0 %v406_v60  ;;  %v2207_v60 = vld [vmem:[#allocation2 + $0x24c] sm:$0xff] }
  0x27   :  { %547 = vmatpush.msra.mxu0 %v403_v1  ;;  %v526_v1 = vunpack.c.l.bf16 %v2207_v60 }
  0x29   :  { %548 = vmatpush.msra.mxu0 %v400_v6  ;;  %614 = vmatpush.msra.mxu3 %v526_v1  ;;  %v2217_v6 = vld [vmem:[#allocation2 + $0x228] sm:$0xff]  ;;  %v2266_v1 = vld [vmem:[#allocation2 + $0x1e0] sm:$0xff] }
  0x2b   :  { %549 = vmatpush.msra.mxu0 %v397_v12  ;;  %v517_v12 = vunpack.c.l.bf16 %v2217_v6 }
  0x2d   :  { %550 = vmatpush.msra.mxu0 %v394_v17  ;;  %v2229_v17 = vld [vmem:[#allocation2 + $0x21c] sm:$0xff] }
  0x2f   :  { %551 = vmatpush.msra.mxu0 %v391_v38  ;;  %v416_v38 = vunpack.c.h.bf16 %v2108_v31  ;;  %v458_v31 = vunpack.c.h.bf16 %v2132_v49  ;;  %v407_v49 = vunpack.c.h.bf16 %v2134_v51  ;;  %v449_v51 = vunpack.c.h.bf16 %v2191_v42 }
  0x31   :  { %552 = vmatpush.msra.mxu0 %v388_v45  ;;  %v2253_v45 = vld [vmem:[#allocation2 + $0x1f8] sm:$0xff] }
  0x8d   :  { %v139_v39 = vpop.f32.mrf.mxu0 }
  0x8e   :  { %v2143_v57 = vadd.f32 %v139_v39, %v110_v46  ;;  %v451_v39 = vunpack.c.l.bf16 %v2185_v35  ;;  %v448_v46 = vunpack.c.l.bf16 %v2191_v42  ;;  %v398_v42 = vunpack.c.h.bf16 %v2152_v2 }
  0x90   :  { %v203_v4 = vsel %vm202_vm1, %v2143_v57, 0.0  ;;  %v214_v9 = vmul.f32 %v2143_v57, %v2143_v57  ;;  %567 = vmatpush.msra.mxu1 %v451_v39  ;;  %v2251_v39 = vld [vmem:[#allocation2 + $0xc0] sm:$0xff] }
  0x92   :  { %v218_v19 = vsel %vm202_vm1, %v214_v9, 0.0  ;;  %568 = vmatpush.msra.mxu1 %v448_v46  ;;  %v505_v46 = vunpack.c.l.bf16 %v2253_v45 }
  0x93   :  { %v159_v50 = vpop.f32.mrf.mxu2 }
  0x94   :  { %v2145_v58 = vadd.f32 %v159_v50, %v111_v47  ;;  %v2195_v47 = vld [vmem:[#allocation2 + $0x18] sm:$0xff]  ;;  %v2199_v50 = vld [vmem:[#allocation2 + $0xc] sm:$0xff]  ;;  %569 = vmatpush.msra.mxu1 %v445_v53 }
  0x95   :  { %v199_v61 = vpop.f32.mrf.mxu0  ;;  %v385_v52 = vunpack.c.l.bf16 %v2195_v47 }
  0x96   :  { %v2154_v3 = vadd.f32 %v199_v61, %v113_v59  ;;  %v204_v5 = vsel %vm202_vm1, %v2145_v58, 0.0  ;;  %v215_v10 = vmul.f32 %v2145_v58, %v2145_v58  ;;  %v2205_v59 = vld [vmem:[#allocation2 + $0x234] sm:$0xff]  ;;  %v382_v61 = vunpack.c.l.bf16 %v2199_v50  ;;  %570 = vmatpush.msra.mxu1 %v442_v63 }
  0x97   :  { %v205_v13 = vadd.f32 %v204_v5, %v203_v4  ;;  %553 = vmatpush.msra.mxu0 %v385_v52  ;;  %v2213_v4 = vld [vmem:[#allocation2] sm:$0xff]  ;;  %v2215_v5 = vld [vmem:[#allocation2 + $0xf0] sm:$0xff]  ;;  %v413_v52 = vunpack.c.h.bf16 %v2122_v40  ;;  %v521_v53 = vunpack.c.h.bf16 %v2205_v59  ;;  %v410_v63 = vunpack.c.h.bf16 %v2128_v44 }
  0x98   :  { %v209_v16 = vsel %vm208_vm2, %v2154_v3, 0.0  ;;  %v219_v20 = vsel %vm202_vm1, %v215_v10, 0.0  ;;  %v217_v22 = vmul.f32 %v2154_v3, %v2154_v3  ;;  %v379_v9 = vunpack.c.l.bf16 %v2213_v4 }
  0x99   :  { %v220_v24 = vadd.f32 %v219_v20, %v218_v19  ;;  %554 = vmatpush.msra.mxu0 %v382_v61  ;;  %v439_v10 = vunpack.c.l.bf16 %v2215_v5  ;;  %v514_v19 = vunpack.c.l.bf16 %v2229_v17  ;;  %v422_v20 = vunpack.c.h.bf16 %v2100_v26  ;;  %v2260_v61 = vld [vmem:[#allocation2 + $0x1ec] sm:$0xff] }
  0x9a   :  { %v223_v29 = vsel %vm208_vm2, %v217_v22, 0.0  ;;  %v2237_v22 = vld [vmem:[#allocation2 + $0x210] sm:$0xff]  ;;  %v464_v26 = vunpack.c.h.bf16 %v2117_v37  ;;  %v427_v37 = vunpack.c.l.bf16 %v2251_v39  ;;  %v455_v40 = vunpack.c.h.bf16 %v2138_v54 }
  0x9b   :  { %v179_v7 = vpop.f32.mrf.mxu2  ;;  %555 = vmatpush.msra.mxu0 %v379_v9  ;;  %571 = vmatpush.msra.mxu1 %v439_v10  ;;  %v2272_v9 = vld [vmem:[#allocation2 + $0x1d4] sm:$0xff]  ;;  %v452_v44 = vunpack.c.h.bf16 %v2185_v35  ;;  %v404_v54 = vunpack.c.h.bf16 %v2140_v55  ;;  %v512_v10 = vunpack.c.h.bf16 %v2237_v22  ;;  %v401_v35 = vunpack.c.h.bf16 %v2148_v62 }
  0x9c   :  { %v2167_v11 = vadd.f32 %v179_v7, %v112_v0  ;;  %v520_v0 = vunpack.c.l.bf16 %v2205_v59  ;;  %v473_v7 = vunpack.c.h.bf16 %v2106_v30  ;;  %v470_v30 = vunpack.c.h.bf16 %v2111_v33 }
  0x9d   :  { %v499_v59 = vunpack.c.l.bf16 %v2266_v1  ;;  %v446_v55 = vunpack.c.h.bf16 %v2197_v48  ;;  %v443_v62 = vunpack.c.h.bf16 %v2203_v56  ;;  %v395_v48 = vunpack.c.h.bf16 %v2161_v8 }
  0x9e   :  { %v216_v14 = vmul.f32 %v2167_v11, %v2167_v11  ;;  %v206_v15 = vsel %vm202_vm1, %v2167_v11, 0.0  ;;  %580 = vmatpush.msra.mxu2 %v520_v0  ;;  %640 = vmatpush.msrb.mxu0 %v473_v7  ;;  %v518_v0 = vunpack.c.h.bf16 %v2217_v6  ;;  %v515_v7 = vunpack.c.h.bf16 %v2229_v17  ;;  %v2284_v17 = vld [vmem:[#allocation2 + $0x1bc] sm:$0xff] }
  0x9f   :  { %v207_v18 = vadd.f32 %v206_v15, %v205_v13  ;;  %v2223_v13 = vld [vmem:[#allocation2 + $0x240] sm:$0xff]  ;;  %v425_v15 = vunpack.c.h.bf16 %v2098_v25  ;;  %v467_v25 = vunpack.c.h.bf16 %v2115_v36  ;;  %v496_v6 = vunpack.c.l.bf16 %v2272_v9 }
  0xa0   :  { %v221_v23 = vsel %vm202_vm1, %v216_v14, 0.0  ;;  %v523_v14 = vunpack.c.l.bf16 %v2223_v13  ;;  %581 = vmatpush.msra.mxu2 %v517_v12  ;;  %641 = vmatpush.msrb.mxu0 %v470_v30  ;;  %v2278_v12 = vld [vmem:[#allocation2 + $0x1c8] sm:$0xff]  ;;  %v490_v30 = vunpack.c.l.bf16 %v2284_v17  ;;  %v392_v56 = vunpack.c.h.bf16 %v2183_v34 }
  0xa1   :  { %v210_v21 = vadd.f32 %v209_v16, %v207_v18  ;;  %v222_v28 = vadd.f32 %v221_v23, %v220_v24  ;;  %v2227_v16 = vld [vmem:[#allocation2 + $0xe4] sm:$0xff]  ;;  %v511_v23 = vunpack.c.l.bf16 %v2237_v22  ;;  %v419_v24 = vunpack.c.h.bf16 %v2102_v27 }
  0xa2   :  { %v436_v18 = vunpack.c.l.bf16 %v2227_v16  ;;  %615 = vmatpush.msra.mxu3 %v523_v14  ;;  %582 = vmatpush.msra.mxu2 %v514_v19  ;;  %v461_v27 = vunpack.c.h.bf16 %v2126_v43  ;;  %v502_v43 = vunpack.c.l.bf16 %v2260_v61  ;;  %v493_v14 = vunpack.c.l.bf16 %v2278_v12  ;;  %v2290_v19 = vld [vmem:[#allocation2 + $0x1b0] sm:$0xff] }
  0xa3   :  { %211 = vadd.xlane.f32.xlu0 %v210_v21  ;;  %v224_v32 = vadd.f32 %v223_v29, %v222_v28  ;;  %v2235_v21 = vld [vmem:[#allocation2 + $0xd8] sm:$0xff]  ;;  %v2243_v28 = vld [vmem:[#allocation2 + $0xcc] sm:$0xff]  ;;  %v2245_v29 = vld [vmem:[#allocation2 + $0x204] sm:$0xff]  ;;  %642 = vmatpush.msrb.mxu0 %v467_v25  ;;  %v503_v22 = vunpack.c.h.bf16 %v2260_v61  ;;  %v437_v8 = vunpack.c.h.bf16 %v2227_v16  ;;  %v497_v34 = vunpack.c.h.bf16 %v2272_v9 }
  0xa4   :  { %620 = vmatpush.msrb.mxu3 %v425_v15  ;;  %v433_v33 = vunpack.c.l.bf16 %v2235_v21  ;;  %572 = vmatpush.msra.mxu1 %v436_v18  ;;  %v430_v36 = vunpack.c.l.bf16 %v2243_v28  ;;  %v509_v15 = vunpack.c.h.bf16 %v2245_v29  ;;  %v506_v18 = vunpack.c.h.bf16 %v2253_v45  ;;  %v349_v25 = vld [vmem:[#allocation2 + $0x1a4] sm:$0xff] }
  0xa5   :  { %583 = vmatpush.msra.mxu2 %v511_v23  ;;  %643 = vmatpush.msrb.mxu0 %v464_v26  ;;  %v484_v2 = vunpack.c.l.bf16 %v349_v25  ;;  %v500_v23 = vunpack.c.h.bf16 %v2266_v1  ;;  %v428_v61 = vunpack.c.h.bf16 %v2251_v39  ;;  %v485_v39 = vunpack.c.h.bf16 %v349_v25  ;;  %v1801_v9 = vld [vmem:[%s2830_s8 + $0x1] ss:$8 sm:$0xf] }
  0xa6   :  { %621 = vmatpush.msrb.mxu3 %v422_v20  ;;  %573 = vmatpush.msra.mxu1 %v433_v33  ;;  %v487_v20 = vunpack.c.l.bf16 %v2290_v19  ;;  %v440_v33 = vunpack.c.h.bf16 %v2215_v5  ;;  %v389_v5 = vunpack.c.h.bf16 %v2189_v41  ;;  %v491_v41 = vunpack.c.h.bf16 %v2284_v17 }
  0xa7   :  { %644 = vmatpush.msrb.mxu0 %v461_v27  ;;  %v386_v27 = vunpack.c.h.bf16 %v2195_v47  ;;  %v380_v47 = vunpack.c.h.bf16 %v2213_v4 }
  0xa8   :  { %622 = vmatpush.msrb.mxu3 %v419_v24  ;;  %574 = vmatpush.msra.mxu1 %v430_v36  ;;  %v347_v24 = vld [vmem:[#allocation2 + $0x198] sm:$0xff]  ;;  %v345_v36 = vld [vmem:[#allocation2 + $0x18c] sm:$0xff] }
  0xa9   :  { %645 = vmatpush.msrb.mxu0 %v458_v31  ;;  %v478_v45 = vunpack.c.l.bf16 %v345_v36 }
  0xaa   :  { %623 = vmatpush.msrb.mxu3 %v416_v38  ;;  %575 = vmatpush.msra.mxu1 %v427_v37  ;;  %v434_v38 = vunpack.c.h.bf16 %v2235_v21  ;;  %v494_v37 = vunpack.c.h.bf16 %v2278_v12  ;;  %v383_v21 = vunpack.c.h.bf16 %v2199_v50  ;;  %v488_v50 = vunpack.c.h.bf16 %v2290_v19 }
  0xab   :  { %225 = vadd.xlane.f32.xlu0 %v224_v32  ;;  %v508_v32 = vunpack.c.l.bf16 %v2245_v29  ;;  %646 = vmatpush.msrb.mxu0 %v455_v40  ;;  %v481_v29 = vunpack.c.l.bf16 %v347_v24  ;;  %v244_v12 = vperm.slane %v1801_v9, 2 }
  0xac   :  { %624 = vmatpush.msrb.mxu3 %v413_v52  ;;  %660 = vmatpush.msrb.mxu1 %v521_v53  ;;  %v527_v52 = vunpack.c.h.bf16 %v2207_v60 }
  0xad   :  { %584 = vmatpush.msra.mxu2 %v508_v32  ;;  %647 = vmatpush.msrb.mxu0 %v452_v44  ;;  %v343_v32 = vld [vmem:[#allocation2 + $0x180] sm:$0xff] }
  0xae   :  { %625 = vmatpush.msrb.mxu3 %v410_v63  ;;  %661 = vmatpush.msrb.mxu1 %v518_v0  ;;  %v475_v16 = vunpack.c.l.bf16 %v343_v32  ;;  %v482_v63 = vunpack.c.h.bf16 %v347_v24  ;;  %v479_v0 = vunpack.c.h.bf16 %v345_v36  ;;  %v476_v1 = vunpack.c.h.bf16 %v343_v32  ;;  %v378_v36 = vld [vmem:[#allocation2 + $0x254] sm:$0xf] }
  0xaf   :  { %585 = vmatpush.msra.mxu2 %v505_v46  ;;  %648 = vmatpush.msrb.mxu0 %v449_v51  ;;  %v431_v46 = vunpack.c.h.bf16 %v2243_v28  ;;  %v524_v28 = vunpack.c.h.bf16 %v2223_v13  ;;  %v245_v51 = vperm.slane %v1801_v9, 3 }
  0xb0   :  { %626 = vmatpush.msrb.mxu3 %v407_v49  ;;  %662 = vmatpush.msrb.mxu1 %v515_v7 }
  0xb1   :  { %586 = vmatpush.msra.mxu2 %v502_v43  ;;  %649 = vmatpush.msrb.mxu0 %v446_v55 }
  0xb2   :  { %627 = vmatpush.msrb.mxu3 %v404_v54  ;;  %663 = vmatpush.msrb.mxu1 %v512_v10  ;;  %v242_v54 = vperm.slane %v1801_v9, 0  ;;  %v243_v10 = vperm.slane %v1801_v9, 1  ;;  %v332_v9 = vld [vmem:[#allocation2 + $0x140] sm:$0xf] }
  0xb3   :  { %587 = vmatpush.msra.mxu2 %v499_v59  ;;  %650 = vmatpush.msrb.mxu0 %v443_v62 }
  0xb4   :  { %628 = vmatpush.msrb.mxu3 %v401_v35  ;;  %664 = vmatpush.msrb.mxu1 %v509_v15 }
  0xb5   :  { %588 = vmatpush.msra.mxu2 %v496_v6  ;;  %651 = vmatpush.msrb.mxu0 %v440_v33  ;;  %v1802_v6 = vld [vmem:[%s2830_s8 + $0x2] ss:$8 sm:$0xf] }
  0xb6   :  { %629 = vmatpush.msrb.mxu3 %v398_v42  ;;  %665 = vmatpush.msrb.mxu1 %v506_v18  ;;  %v263_v15 = vperm.slane %v1802_v6, 0  ;;  %v264_v55 = vperm.slane %v1802_v6, 1  ;;  %v265_v18 = vperm.slane %v1802_v6, 2  ;;  %v266_v62 = vperm.slane %v1802_v6, 3  ;;  %v300_v6 = vld [vmem:[#allocation2 + $0x80] sm:$0xf] }
  0xb7   :  { %589 = vmatpush.msra.mxu2 %v493_v14  ;;  %652 = vmatpush.msrb.mxu0 %v437_v8  ;;  %v374_v8 = vld [vmem:[#allocation2 + $0x23c] sm:$0xf] }
  0xb8   :  { %630 = vmatpush.msrb.mxu3 %v395_v48  ;;  %666 = vmatpush.msrb.mxu1 %v503_v22 }
  0xb9   :  { %590 = vmatpush.msra.mxu2 %v490_v30  ;;  %653 = vmatpush.msrb.mxu0 %v434_v38  ;;  %v308_v38 = vld [vmem:[#allocation2 + $0xb0] sm:$0xf] }
  0xba   :  { %631 = vmatpush.msrb.mxu3 %v392_v56  ;;  %667 = vmatpush.msrb.mxu1 %v500_v23  ;;  %v310_v23 = vld [vmem:[#allocation2 + $0xbc] sm:$0xf] }
  0xbb   :  { %591 = vmatpush.msra.mxu2 %v487_v20  ;;  %654 = vmatpush.msrb.mxu0 %v431_v46  ;;  %v426_v32 = vunpack.c.l.bf16 %v310_v23  ;;  %v376_v46 = vld [vmem:[#allocation2 + $0x248] sm:$0xf] }
  0xbc   :  { %632 = vmatpush.msrb.mxu3 %v389_v5  ;;  %668 = vmatpush.msrb.mxu1 %v497_v34  ;;  %v340_v5 = vld [vmem:[#allocation2 + $0x170] sm:$0xf] }
  0xbd   :  { %592 = vmatpush.msra.mxu2 %v484_v2  ;;  %655 = vmatpush.msrb.mxu0 %v428_v61  ;;  %v372_v34 = vld [vmem:[#allocation2 + $0x230] sm:$0xf]  ;;  %v423_v61 = vunpack.c.l.bf16 %v308_v38  ;;  %v290_v38 = vld [vmem:[#allocation2 + $0x44] sm:$0xf] }
  0xbe   :  { %633 = vmatpush.msrb.mxu3 %v386_v27  ;;  %669 = vmatpush.msrb.mxu1 %v494_v37 }
  0xbf   :  { %593 = vmatpush.msra.mxu2 %v481_v29 }
  0xc0   :  { %634 = vmatpush.msrb.mxu3 %v383_v21  ;;  %670 = vmatpush.msrb.mxu1 %v491_v41  ;;  %v522_v21 = vunpack.c.l.bf16 %v374_v8  ;;  %v338_v41 = vld [vmem:[#allocation2 + $0x164] sm:$0xf] }
  0xc1   :  { %594 = vmatpush.msra.mxu2 %v478_v45 }
  0xc2   :  { %635 = vmatpush.msrb.mxu3 %v380_v47  ;;  %671 = vmatpush.msrb.mxu1 %v488_v50  ;;  %v471_v47 = vunpack.c.l.bf16 %v340_v5  ;;  %v519_v50 = vunpack.c.l.bf16 %v372_v34  ;;  %v354_v5 = vld [vmem:[#allocation2 + $0x1c4] sm:$0xf] }
  0xc3   :  { %595 = vmatpush.msra.mxu2 %v475_v16 }
  0xc4   :  { %672 = vmatpush.msrb.mxu1 %v485_v39  ;;  %v468_v39 = vunpack.c.l.bf16 %v338_v41 }
  0xc5   :  { %694 = vmatpush.msrb.mxu2 %v527_v52  ;;  %v306_v52 = vld [vmem:[#allocation2 + $0xa4] sm:$0xf] }
  0xc6   :  { %673 = vmatpush.msrb.mxu1 %v482_v63 }
  0xc7   :  { %695 = vmatpush.msrb.mxu2 %v524_v28  ;;  %v370_v28 = vld [vmem:[#allocation2 + $0x224] sm:$0xf] }
  0xc8   :  { %674 = vmatpush.msrb.mxu1 %v479_v0  ;;  %v516_v63 = vunpack.c.l.bf16 %v370_v28  ;;  %v492_v28 = vunpack.c.l.bf16 %v354_v5 }
  0xca   :  { %675 = vmatpush.msrb.mxu1 %v476_v1 }
 0x116   :  { %v212_v26 = vpop.xlane.xlu0 %211 }
 0x117   :  { %v2309_v53 = vmul.f32 0.0025, %v212_v26 }
 0x119   :  { %v228_v31 = vmul.f32 %v2309_v53, %v2309_v53  ;;  %v254_v35 = vsub.f32 %v2143_v57, %v2309_v53  ;;  %v255_v17 = vsub.f32 %v2145_v58, %v2309_v53  ;;  %v256_v30 = vsub.f32 %v2167_v11, %v2309_v53  ;;  %v342_v58 = vld [vmem:[#allocation2 + $0x17c] sm:$0xf] }
 0x11a   :  { %v257_v19 = vsub.f32 %v2154_v3, %v2309_v53  ;;  %v474_v3 = vunpack.c.l.bf16 %v342_v58  ;;  %v528_v53 = vunpack.c.l.bf16 %v378_v36  ;;  %v324_v58 = vld [vmem:[#allocation2 + $0x110] sm:$0xf]  ;;  %v322_v36 = vld [vmem:[#allocation2 + $0x104] sm:$0xf] }
 0x11b   :  { %v444_v41 = vunpack.c.l.bf16 %v322_v36 }
 0x11e   :  { %v226_v60 = vpop.xlane.xlu0 %225 }
 0x11f   :  { %v227_v43 = vmul.f32 0.0025, %v226_v60  ;;  %v304_v60 = vld [vmem:[#allocation2 + $0x98] sm:$0xf] }
 0x120   :  { %v417_v0 = vunpack.c.l.bf16 %v304_v60 }
 0x121   :  { %v229_v4 = vsub.f32 %v227_v43, %v228_v31  ;;  %v336_v31 = vld [vmem:[#allocation2 + $0x158] sm:$0xf]  ;;  %v525_v43 = vunpack.c.l.bf16 %v376_v46 }
 0x122   :  { %v465_v1 = vunpack.c.l.bf16 %v336_v31  ;;  %v286_v31 = vld [vmem:[#allocation2 + $0x2c] sm:$0xf] }
 0x123   :  { %v230_v13 = vadd.f32 1e-05, %v229_v4  ;;  %v420_v4 = vunpack.c.l.bf16 %v306_v52  ;;  %v320_v52 = vld [vmem:[#allocation2 + $0xf8] sm:$0xf] }
 0x124   :  { %v441_v60 = vunpack.c.l.bf16 %v320_v52 }
 0x125   :  { %1932 = vrsqrt.f32 %v230_v13  ;;  %vm237_vm4 = vweird.f32 %v230_v13 }
 0x12b   :  { %v1933_v40 = vpop.eup %1932 }
 0x12c   :  { %v232_v59 = vmul.f32 %v1933_v40, %v230_v13  ;;  %vm238_vm3 = vweird.f32 %v1933_v40  ;;  %v368_v13 = vld [vmem:[#allocation2 + $0x218] sm:$0xf] }
 0x12d   :  { %vm239_vm5 = vmor %vm237_vm4, %vm238_vm3  ;;  %vm1712_vm4 = vcmask 359424  }
 0x12e   :  { %v233_v49 = vmul.f32 %v1933_v40, %v232_v59  ;;  %v513_v59 = vunpack.c.l.bf16 %v368_v13  ;;  %v316_v13 = vld [vmem:[#allocation2 + $0xe0] sm:$0xf] }
 0x130   :  { %v234_v7 = vmul.f32 0.5, %v233_v49  ;;  %v302_v49 = vld [vmem:[#allocation2 + $0x8c] sm:$0xf] }
 0x132   :  { %v235_v44 = vsub.f32 1.5, %v234_v7  ;;  %v366_v7 = vld [vmem:[#allocation2 + $0x20c] sm:$0xf] }
 0x134   :  { %v236_v14 = vmul.f32 %v1933_v40, %v235_v44 }
 0x136   :  { %v240_v42 = vsel %vm239_vm5, %v1933_v40, %v236_v14  ;;  %v334_v40 = vld [vmem:[#allocation2 + $0x14c] sm:$0xf]  ;;  %v2347_v14 = vld [vmem:[%s2826_s4] sm:$0xff]  ;;  %vm1782_vm5 = vcmask 25600  }
 0x137   :  { %v250_v20 = vmul.f32 %v242_v54, %v240_v42  ;;  %v251_v48 = vmul.f32 %v243_v10, %v240_v42  ;;  %v252_v22 = vmul.f32 %v244_v12, %v240_v42  ;;  %v253_v25 = vmul.f32 %v245_v51, %v240_v42  ;;  %v364_v54 = vld [vmem:[#allocation2 + $0x200] sm:$0xf]  ;;  %v330_v51 = vld [vmem:[#allocation2 + $0x134] sm:$0xf] }
 0x138   :  { %v462_v44 = vunpack.c.l.bf16 %v334_v40  ;;  %v414_v10 = vunpack.c.l.bf16 %v302_v49  ;;  %v510_v12 = vunpack.c.l.bf16 %v366_v7  ;;  %v507_v42 = vunpack.c.l.bf16 %v364_v54  ;;  %v282_v7 = vld [vmem:[#allocation2 + $0x14] sm:$0xf]  ;;  %v312_v54 = vld [vmem:[#allocation2 + $0xc8] sm:$0xf] }
 0x139   :  { %v258_v57 = vmul.f32 %v254_v35, %v250_v20  ;;  %v259_v2 = vmul.f32 %v255_v17, %v251_v48  ;;  %v260_v33 = vmul.f32 %v256_v30, %v252_v22  ;;  %v261_v56 = vmul.f32 %v257_v19, %v253_v25  ;;  %v362_v17 = vld [vmem:[#allocation2 + $0x1f4] sm:$0xf]  ;;  %v360_v20 = vld [vmem:[#allocation2 + $0x1e8] sm:$0xf]  ;;  %v326_v25 = vld [vmem:[#allocation2 + $0x11c] sm:$0xf] }
 0x13a   :  { %v459_v35 = vunpack.c.l.bf16 %v332_v9  ;;  %v411_v30 = vunpack.c.l.bf16 %v300_v6  ;;  %v456_v19 = vunpack.c.l.bf16 %v330_v51  ;;  %v504_v22 = vunpack.c.l.bf16 %v362_v17  ;;  %v346_v9 = vld [vmem:[#allocation2 + $0x194] sm:$0xf]  ;;  %v280_v51 = vld [vmem:[#allocation2 + $0x8] sm:$0xf] }
 0x13b   :  { %v271_v24 = vadd.f32 %v263_v15, %v258_v57  ;;  %v272_v29 = vadd.f32 %v264_v55, %v259_v2  ;;  %v273_v11 = vadd.f32 %v265_v18, %v260_v33  ;;  %v274_v26 = vadd.f32 %v266_v62, %v261_v56  ;;  %v298_v15 = vld [vmem:[#allocation2 + $0x74] sm:$0xf]  ;;  %v328_v18 = vld [vmem:[#allocation2 + $0x128] sm:$0xf]  ;;  %v294_v2 = vld [vmem:[#allocation2 + $0x5c] sm:$0xf] }
 0x13c   :  { %v845_v55 = vunpack.c.l.bf16 %v2347_v14  ;;  %v296_v62 = vld [vmem:[#allocation2 + $0x68] sm:$0xf]  ;;  %v408_v48 = vunpack.c.l.bf16 %v298_v15  ;;  %v453_v57 = vunpack.c.l.bf16 %v328_v18  ;;  %v358_v33 = vld [vmem:[#allocation2 + $0x1dc] sm:$0xf]  ;;  %v501_v23 = vunpack.c.l.bf16 %v360_v20 }
 0x13d   :  { %v2331_v45 = vmax.f32 %v271_v24, 0.0  ;;  %v2333_v27 = vmax.f32 %v272_v29, 0.0  ;;  %v2335_v37 = vmax.f32 %v273_v11, 0.0  ;;  %v2337_v16 = vmax.f32 %v274_v26, 0.0  ;;  %v292_v29 = vld [vmem:[#allocation2 + $0x50] sm:$0xf] }
 0x13e   :  { %v405_v56 = vunpack.c.l.bf16 %v296_v62  ;;  %v450_v24 = vunpack.c.l.bf16 %v326_v25  ;;  %v356_v11 = vld [vmem:[#allocation2 + $0x1d0] sm:$0xf]  ;;  %v402_v26 = vunpack.c.l.bf16 %v294_v2  ;;  %v498_v8 = vunpack.c.l.bf16 %v358_v33 }
 0x13f   :  { %556 = vmatmul.f32.vlgmr.msra.gmra.mxu0 %v2331_v45  ;;  %576 = vmatmul.f32.vlgmr.msra.gmra.mxu1 %v2333_v27  ;;  %v399_v46 = vunpack.c.l.bf16 %v292_v29  ;;  %v435_v49 = vunpack.c.l.bf16 %v316_v13  ;;  %v384_v15 = vunpack.c.l.bf16 %v282_v7  ;;  %v480_v17 = vunpack.c.l.bf16 %v346_v9  ;;  %v2382_v29 = vld [vmem:[#allocation2 + $0x30c] sm:$0xff] }
 0x140   :  { %596 = vmatmul.f32.vlgmr.msra.gmra.mxu2 %v2335_v37  ;;  %1815 = vmatmul.msk.f32.vlgmr.msra.gmra.mxu3 %vm536_vm6, %v2337_v16  ;;  %v846_v18 = vunpack.c.h.bf16 %v2347_v14 }
 0x141   :  { %700 = vmatpush.msra.mxu2 %v426_v32  ;;  %720 = vmatpush.msra.mxu3 %v474_v3  ;;  %v2359_v32 = vld [vmem:[%s2826_s4 + $0x8] sm:$0xff]  ;;  %v447_v3 = vunpack.c.l.bf16 %v324_v58 }
 0x142   :  { %740 = vmatpush.msra.mxu0 %v522_v21  ;;  %774 = vmatpush.msra.mxu1 %v528_v53  ;;  %v848_v34 = vunpack.c.h.bf16 %v2359_v32  ;;  %v495_v21 = vunpack.c.l.bf16 %v356_v11  ;;  %v288_v53 = vld [vmem:[#allocation2 + $0x38] sm:$0xf]  ;;  %v2384_v11 = vld [vmem:[#allocation2 + $0x300] sm:$0xff] }
 0x143   :  { %701 = vmatpush.msra.mxu2 %v423_v61  ;;  %721 = vmatpush.msra.mxu3 %v471_v47  ;;  %v352_v61 = vld [vmem:[#allocation2 + $0x1b8] sm:$0xf]  ;;  %v396_v47 = vunpack.c.l.bf16 %v290_v38  ;;  %v2390_v38 = vld [vmem:[#allocation2 + $0x3cc] sm:$0xff] }
 0x144   :  { %741 = vmatpush.msra.mxu0 %v519_v50  ;;  %775 = vmatpush.msra.mxu1 %v525_v43  ;;  %v318_v50 = vld [vmem:[#allocation2 + $0xec] sm:$0xf] }
 0x145   :  { %702 = vmatpush.msra.mxu2 %v420_v4  ;;  %722 = vmatpush.msra.mxu3 %v468_v39  ;;  %v350_v43 = vld [vmem:[#allocation2 + $0x1ac] sm:$0xf]  ;;  %v393_v4 = vunpack.c.l.bf16 %v288_v53  ;;  %v489_v39 = vunpack.c.l.bf16 %v352_v61  ;;  %v2399_v61 = vld [vmem:[#allocation2 + $0x3b4] sm:$0xff] }
 0x146   :  { %742 = vmatpush.msra.mxu0 %v516_v63  ;;  %v284_v63 = vld [vmem:[#allocation2 + $0x20] sm:$0xf]  ;;  %v486_v40 = vunpack.c.l.bf16 %v350_v43 }
 0x147   :  { %703 = vmatpush.msra.mxu2 %v417_v0  ;;  %723 = vmatpush.msra.mxu3 %v465_v1  ;;  %v348_v0 = vld [vmem:[#allocation2 + $0x1a0] sm:$0xf]  ;;  %v390_v1 = vunpack.c.l.bf16 %v286_v31 }
 0x148   :  { %743 = vmatpush.msra.mxu0 %v513_v59  ;;  %636 = vmatmul.f32.vlgmr.msrb.gmra.mxu3 %v2331_v45  ;;  %v314_v59 = vld [vmem:[#allocation2 + $0xd4] sm:$0xf]  ;;  %v483_v6 = vunpack.c.l.bf16 %v348_v0  ;;  %v1803_v31 = vld [vmem:[%s2830_s8 + $0x3] ss:$8 sm:$0xf] }
 0x149   :  { %656 = vmatmul.f32.vlgmr.msrb.gmra.mxu0 %v2333_v27  ;;  %676 = vmatmul.f32.vlgmr.msrb.gmra.mxu1 %v2335_v37 }
 0x14a   :  { %1816 = vmatmul.msk.f32.vlgmr.msrb.gmra.mxu2 %vm536_vm6, %v2337_v16  ;;  %724 = vmatpush.msra.mxu3 %v462_v44  ;;  %v387_v44 = vunpack.c.l.bf16 %v284_v63 }
 0x14b   :  { %704 = vmatpush.msra.mxu2 %v414_v10  ;;  %744 = vmatpush.msra.mxu0 %v510_v12  ;;  %v842_v10 = vld [vmem:[%s2823_s1] sm:$0x3]  ;;  %v432_v12 = vunpack.c.l.bf16 %v314_v59  ;;  %v2418_v59 = vld [vmem:[#allocation2 + $0x2c4] sm:$0xff]  ;;  %s1791_s1 = sshll.u32 %s2834_s12, 4  ;;  %s1792_s1 = int_to_ptr.hbm [resolvable:$true] %s1791_s1 }
 0x14c   :  { %725 = vmatpush.msra.mxu3 %v459_v35  ;;  %1818 = vmatpush.msk.msrb.mxu1 %vm862_vm7, %v845_v55  ;;  %v344_v35 = vld [vmem:[#allocation2 + $0x188] sm:$0xf]  ;;  %v429_v55 = vunpack.c.l.bf16 %v312_v54  ;;  %v851_v54 = vperm.slane %v1803_v31, 1 }
 0x14d   :  { %705 = vmatpush.msra.mxu2 %v411_v30  ;;  %745 = vmatpush.msra.mxu0 %v507_v42  ;;  %v381_v30 = vunpack.c.l.bf16 %v280_v51  ;;  %v477_v42 = vunpack.c.l.bf16 %v344_v35  ;;  %v852_v35 = vperm.slane %v1803_v31, 2 }
 0x14e   :  { %726 = vmatpush.msra.mxu3 %v456_v19  ;;  %v847_v19 = vunpack.c.l.bf16 %v2359_v32  ;;  %v1176_v32 = vunpack.c.l.bf16 %v2382_v29 }
 0x14f   :  { %706 = vmatpush.msra.mxu2 %v408_v48  ;;  %746 = vmatpush.msra.mxu0 %v504_v22 }
 0x150   :  { %727 = vmatpush.msra.mxu3 %v453_v57 }
 0x151   :  { %707 = vmatpush.msra.mxu2 %v405_v56  ;;  %747 = vmatpush.msra.mxu0 %v501_v23 }
 0x152   :  { %728 = vmatpush.msra.mxu3 %v450_v24  ;;  %1817 = vmatmul.msk.f32.vlgmr.msra.gmra.mxu1 %vm536_vm6, %v2337_v16  ;;  %v438_v16 = vunpack.c.l.bf16 %v318_v50  ;;  %v1218_v50 = vunpack.c.l.bf16 %v2399_v61 }
 0x153   :  { %708 = vmatpush.msra.mxu2 %v402_v26  ;;  %748 = vmatpush.msra.mxu0 %v498_v8  ;;  %v2386_v26 = vld [vmem:[#allocation2 + $0x2f4] sm:$0xff] }
 0x154   :  { %729 = vmatpush.msra.mxu3 %v447_v3  ;;  %1824 = vmatpush.msk.msra.mxu1 %vm862_vm7, %v848_v34  ;;  %v1173_v3 = vunpack.c.l.bf16 %v2384_v11  ;;  %v2392_v34 = vld [vmem:[#allocation2 + $0x2e8] sm:$0xff] }
 0x155   :  { %709 = vmatpush.msra.mxu2 %v399_v46  ;;  %749 = vmatpush.msra.mxu0 %v495_v21  ;;  %v1224_v46 = vunpack.c.l.bf16 %v2390_v38  ;;  %v2395_v21 = vld [vmem:[#allocation2 + $0x3c0] sm:$0xff]  ;;  %v1167_v43 = vunpack.c.l.bf16 %v2392_v34 }
 0x156   :  { %730 = vmatpush.msra.mxu3 %v444_v41  ;;  %v1170_v41 = vunpack.c.l.bf16 %v2386_v26  ;;  %v1221_v53 = vunpack.c.l.bf16 %v2395_v21 }
 0x157   :  { %710 = vmatpush.msra.mxu2 %v396_v47  ;;  %750 = vmatpush.msra.mxu0 %v492_v28  ;;  %v2401_v47 = vld [vmem:[#allocation2 + $0x3a8] sm:$0xff]  ;;  %v2403_v28 = vld [vmem:[#allocation2 + $0x2dc] sm:$0xff] }
 0x158   :  { %731 = vmatpush.msra.mxu3 %v441_v60  ;;  %v1215_v63 = vunpack.c.l.bf16 %v2401_v47 }
 0x159   :  { %711 = vmatpush.msra.mxu2 %v393_v4  ;;  %751 = vmatpush.msra.mxu0 %v489_v39 }
 0x15a   :  { %732 = vmatpush.msra.mxu3 %v438_v16  ;;  %1819 = vmatmul.msk.f32.vlgmr.msrb.gmra.mxu1 %vm858_vm8, %v842_v10  ;;  %v2414_v16 = vld [vmem:[#allocation2 + $0x2d0] sm:$0xff] }
 0x15b   :  { %712 = vmatpush.msra.mxu2 %v390_v1  ;;  %752 = vmatpush.msra.mxu0 %v486_v40  ;;  %v1164_v1 = vunpack.c.l.bf16 %v2403_v28  ;;  %v850_v40 = vperm.slane %v1803_v31, 0  ;;  %v1161_v9 = vunpack.c.l.bf16 %v2414_v16 }
 0x15c   :  { %733 = vmatpush.msra.mxu3 %v435_v49 }
 0x15d   :  { %713 = vmatpush.msra.mxu2 %v387_v44  ;;  %753 = vmatpush.msra.mxu0 %v483_v6 }
 0x15e   :  { %734 = vmatpush.msra.mxu3 %v432_v12  ;;  %v2425_v12 = vld [vmem:[#allocation2 + $0x2b8] sm:$0xff] }
 0x15f   :  { %714 = vmatpush.msra.mxu2 %v384_v15  ;;  %754 = vmatpush.msra.mxu0 %v480_v17 }
 0x160   :  { %735 = vmatpush.msra.mxu3 %v429_v55  ;;  %v1158_v55 = vunpack.c.l.bf16 %v2418_v59 }
 0x161   :  { %715 = vmatpush.msra.mxu2 %v381_v30  ;;  %755 = vmatpush.msra.mxu0 %v477_v42 }
 0x162   :  { %716 = vmatmul.f32.vlgmr.msra.gmra.mxu2 %v2331_v45  ;;  %736 = vmatmul.f32.vlgmr.msra.gmra.mxu3 %v2333_v27  ;;  %v69_v45 = vld [vmem:[%s2831_s9] ss:$8 sm:$0x7] }
 0x163   :  { %756 = vmatmul.f32.vlgmr.msra.gmra.mxu0 %v2335_v37  ;;  %1820 = vmatpush.msk.msrb.mxu2 %vm862_vm7, %v846_v18  ;;  %v531_v37 = vperm.slane %v69_v45, 1  ;;  %v530_v25 = vperm.slane %v69_v45, 0  ;;  %v532_v52 = vperm.slane %v69_v45, 2 }
 0x164   :  { %1822 = vmatpush.msk.msrb.mxu3 %vm862_vm7, %v847_v19  ;;  %1825 = vmatmul.msk.f32.vlgmr.msra.gmra.mxu1 %vm858_vm8, %v842_v10 }
 0x165   :  { %1291 = vmatpush.msra.mxu2 %v1176_v32 }
 0x166   :  { %1311 = vmatpush.msra.mxu3 %v1224_v46 }
 0x167   :  { %1292 = vmatpush.msra.mxu2 %v1173_v3 }
 0x168   :  { %1312 = vmatpush.msra.mxu3 %v1221_v53 }
 0x169   :  { %1293 = vmatpush.msra.mxu2 %v1170_v41 }
 0x16a   :  { %1821 = vmatmul.msk.f32.vlgmr.msrb.gmra.mxu2 %vm858_vm8, %v842_v10  ;;  %1823 = vmatmul.msk.f32.vlgmr.msrb.gmra.mxu3 %vm858_vm8, %v842_v10  ;;  %v853_v10 = vperm.slane %v1803_v31, 3 }
 0x16b   :  { %1313 = vmatpush.msra.mxu3 %v1218_v50  ;;  %1294 = vmatpush.msra.mxu2 %v1167_v43 }
 0x16d   :  { %1314 = vmatpush.msra.mxu3 %v1215_v63  ;;  %1295 = vmatpush.msra.mxu2 %v1164_v1  ;;  %v2470_v1 = vld [vmem:[#allocation2 + $0x2ac] sm:$0xff] }
 0x16f   :  { %1296 = vmatpush.msra.mxu2 %v1161_v9  ;;  %v2476_v9 = vld [vmem:[#allocation2 + $0x2a0] sm:$0xff] }
 0x171   :  { %1297 = vmatpush.msra.mxu2 %v1158_v55  ;;  %v2490_v55 = vld [vmem:[#allocation2 + $0x378] sm:$0xff] }
 0x1bc   :  { %v577_v14 = vpop.f32.mrf.mxu1  ;;  %v557_v48 = vpop.f32.mrf.mxu0 }
 0x1bd   :  { %v558_v33 = vadd.f32 %v557_v48, %v530_v25 }
 0x1bf   :  { %v578_v24 = vadd.f32 %v577_v14, %v558_v33  ;;  %v1155_v14 = vunpack.c.l.bf16 %v2425_v12 }
 0x1c1   :  { %1298 = vmatpush.msra.mxu2 %v1155_v14  ;;  %v2494_v14 = vld [vmem:[#allocation2 + $0x27c] sm:$0xff] }
 0x1c3   :  { %v617_v62 = vpop.f32.mrf.mxu3  ;;  %v597_v27 = vpop.f32.mrf.mxu2 }
 0x1c4   :  { %v598_v5 = vadd.f32 %v597_v27, %v578_v24 }
 0x1c6   :  { %v677_v20 = vpop.f32.mrf.mxu1  ;;  %v657_v56 = vpop.f32.mrf.mxu0  ;;  %v2412_v4 = vadd.f32 %v617_v62, %v598_v5 }
 0x1c8   :  { %v789_v44 = vmul.f32 %v2412_v4, %v2412_v4  ;;  %v780_v18 = vsel %vm202_vm1, %v2412_v4, 0.0 }
 0x1ca   :  { %v792_v27 = vsel %vm202_vm1, %v789_v44, 0.0  ;;  %v2478_v44 = vld [vmem:[#allocation2 + $0x390] sm:$0xff] }
 0x1cb   :  { %v637_v22 = vpop.f32.mrf.mxu3 }
 0x1cc   :  { %v638_v57 = vadd.f32 %v637_v22, %v531_v37 }
 0x1cd   :  { %v697_v58 = vpop.f32.mrf.mxu2 }
 0x1ce   :  { %v658_v23 = vadd.f32 %v657_v56, %v638_v57 }
 0x1cf   :  { %v777_v2 = vpop.f32.mrf.mxu1 }
 0x1d0   :  { %v678_v8 = vadd.f32 %v677_v20, %v658_v23 }
 0x1d2   :  { %v2406_v60 = vadd.f32 %v697_v58, %v678_v8 }
 0x1d4   :  { %v790_v49 = vmul.f32 %v2406_v60, %v2406_v60  ;;  %v781_v17 = vsel %vm202_vm1, %v2406_v60, 0.0 }
 0x1d5   :  { %v782_v45 = vadd.f32 %v781_v17, %v780_v18  ;;  %v2488_v17 = vld [vmem:[#allocation2 + $0x288] sm:$0xff] }
 0x1d6   :  { %v793_v19 = vsel %vm202_vm1, %v790_v49, 0.0  ;;  %v1152_v49 = vunpack.c.l.bf16 %v2470_v1  ;;  %v1143_v18 = vunpack.c.l.bf16 %v2488_v17 }
 0x1d7   :  { %v892_v36 = vpop.f32.mrf.mxu1  ;;  %v794_v56 = vadd.f32 %v793_v19, %v792_v27  ;;  %v1203_v19 = vunpack.c.l.bf16 %v2490_v55  ;;  %v2500_v27 = vld [vmem:[#allocation2 + $0x270] sm:$0xff] }
 0x1d8   :  { %v2430_v30 = vadd.f32 %v892_v36, %v850_v40  ;;  %v2472_v40 = vld [vmem:[#allocation2 + $0x39c] sm:$0xff]  ;;  %1299 = vmatpush.msra.mxu2 %v1152_v49 }
 0x1da   :  { %v955_v24 = vsel %vm202_vm1, %v2430_v30, 0.0 }
 0x1e0   :  { %v757_v6 = vpop.f32.mrf.mxu0 }
 0x1e1   :  { %v952_v15 = vpop.f32.mrf.mxu1 }
 0x1e2   :  { %v2438_v48 = vadd.f32 %v952_v15, %v853_v10  ;;  %v2482_v10 = vld [vmem:[#allocation2 + $0x294] sm:$0xff] }
 0x1e4   :  { %v960_v46 = vsel %vm208_vm2, %v2438_v48, 0.0  ;;  %v968_v43 = vmul.f32 %v2438_v48, %v2438_v48 }
 0x1e5   :  { %v717_v39 = vpop.f32.mrf.mxu2  ;;  %v737_v13 = vpop.f32.mrf.mxu3 }
 0x1e6   :  { %v718_v0 = vadd.f32 %v717_v39, %v532_v52  ;;  %v974_v63 = vsel %vm208_vm2, %v968_v43, 0.0  ;;  %v1177_v43 = vunpack.c.h.bf16 %v2382_v29  ;;  %v2542_v29 = vld [vmem:[#allocation2 + $0x468] sm:$0xff] }
 0x1e8   :  { %v738_v7 = vadd.f32 %v737_v13, %v718_v0 }
 0x1ea   :  { %v758_v51 = vadd.f32 %v757_v6, %v738_v7  ;;  %v1212_v7 = vunpack.c.l.bf16 %v2472_v40  ;;  %v1149_v6 = vunpack.c.l.bf16 %v2476_v9 }
 0x1ec   :  { %v2432_v42 = vadd.f32 %v777_v2, %v758_v51  ;;  %v965_v2 = vmul.f32 %v2430_v30, %v2430_v30  ;;  %1315 = vmatpush.msra.mxu3 %v1212_v7  ;;  %v2484_v51 = vld [vmem:[#allocation2 + $0x384] sm:$0xff]  ;;  %1300 = vmatpush.msra.mxu2 %v1149_v6  ;;  %v1174_v7 = vunpack.c.h.bf16 %v2384_v11  ;;  %v1222_v6 = vunpack.c.h.bf16 %v2395_v21  ;;  %v2550_v11 = vld [vmem:[#allocation2 + $0x45c] sm:$0xff] }
 0x1ed   :  { %v912_v62 = vpop.f32.mrf.mxu2  ;;  %v932_v20 = vpop.f32.mrf.mxu3  ;;  %v1206_v15 = vunpack.c.l.bf16 %v2484_v51 }
 0x1ee   :  { %v2441_v37 = vadd.f32 %v912_v62, %v851_v54  ;;  %v2443_v22 = vadd.f32 %v932_v20, %v852_v35  ;;  %v784_v25 = vsel %vm783_vm9, %v2432_v42, 0.0  ;;  %v791_v57 = vmul.f32 %v2432_v42, %v2432_v42  ;;  %v2496_v62 = vld [vmem:[#allocation2 + $0x36c] sm:$0xff] }
 0x1ef   :  { %v785_v33 = vadd.f32 %v784_v25, %v782_v45  ;;  %v969_v53 = vsel %vm202_vm1, %v965_v2, 0.0  ;;  %v1209_v54 = vunpack.c.l.bf16 %v2478_v44  ;;  %v1146_v35 = vunpack.c.l.bf16 %v2482_v10  ;;  %v2502_v25 = vld [vmem:[#allocation2 + $0x360] sm:$0xff] }
 0x1f0   :  { %v966_v23 = vmul.f32 %v2441_v37, %v2441_v37  ;;  %v795_v58 = vsel %vm783_vm9, %v791_v57, 0.0  ;;  %v956_v8 = vsel %vm202_vm1, %v2441_v37, 0.0  ;;  %v958_v3 = vsel %vm202_vm1, %v2443_v22, 0.0 }
 0x1f1   :  { %786 = vadd.xlane.f32.xlu2 %v785_v33  ;;  %v796_v36 = vadd.f32 %v795_v58, %v794_v56  ;;  %v957_v32 = vadd.f32 %v956_v8, %v955_v24  ;;  %v967_v5 = vmul.f32 %v2443_v22, %v2443_v22  ;;  %1316 = vmatpush.msra.mxu3 %v1209_v54  ;;  %v1140_v20 = vunpack.c.l.bf16 %v2494_v14  ;;  %v2506_v33 = vld [vmem:[#allocation2 + $0x264] sm:$0xff]  ;;  %v2508_v56 = vld [vmem:[#allocation2 + $0x354] sm:$0xff] }
 0x1f2   :  { %v970_v52 = vsel %vm202_vm1, %v966_v23, 0.0  ;;  %1301 = vmatpush.msra.mxu2 %v1146_v35  ;;  %v1200_v45 = vunpack.c.l.bf16 %v2496_v62  ;;  %v1137_v57 = vunpack.c.l.bf16 %v2500_v27  ;;  %v1197_v2 = vunpack.c.l.bf16 %v2502_v25  ;;  %v2510_v23 = vld [vmem:[#allocation2 + $0x48c] sm:$0xff] }
 0x1f3   :  { %797 = vadd.xlane.f32.xlu0 %v796_v36  ;;  %v959_v41 = vadd.f32 %v958_v3, %v957_v32  ;;  %v971_v31 = vadd.f32 %v970_v52, %v969_v53  ;;  %v972_v39 = vsel %vm202_vm1, %v967_v5, 0.0  ;;  %1317 = vmatpush.msra.mxu3 %v1206_v15  ;;  %v1134_v58 = vunpack.c.l.bf16 %v2506_v33  ;;  %v2515_v36 = vld [vmem:[#allocation2 + $0x4a4] sm:$0xff]  ;;  %v2518_v3 = vld [vmem:[#allocation2 + $0x258] sm:$0xff]  ;;  %v2540_v54 = vld [vmem:[#allocation2 + $0x330] sm:$0xff] }
 0x1f4   :  { %1302 = vmatpush.msra.mxu2 %v1143_v18  ;;  %v1194_v24 = vunpack.c.l.bf16 %v2508_v56  ;;  %v1272_v8 = vunpack.c.l.bf16 %v2510_v23  ;;  %v1278_v32 = vunpack.c.l.bf16 %v2515_v36  ;;  %v2520_v5 = vld [vmem:[#allocation2 + $0x348] sm:$0xff]  ;;  %v1131_v52 = vunpack.c.l.bf16 %v2518_v3 }
 0x1f5   :  { %v961_v50 = vadd.f32 %v960_v46, %v959_v41  ;;  %v973_v13 = vadd.f32 %v972_v39, %v971_v31  ;;  %1318 = vmatpush.msra.mxu3 %v1203_v19  ;;  %v2522_v46 = vld [vmem:[#allocation2 + $0x480] sm:$0xff]  ;;  %v1191_v41 = vunpack.c.l.bf16 %v2520_v5  ;;  %v1225_v39 = vunpack.c.h.bf16 %v2390_v38 }
 0x1f6   :  { %1303 = vmatpush.msra.mxu2 %v1140_v20  ;;  %1331 = vmatpush.msrb.mxu1 %v1272_v8  ;;  %v1269_v53 = vunpack.c.l.bf16 %v2522_v46  ;;  %v1185_v38 = vunpack.c.l.bf16 %v2540_v54  ;;  %v1263_v35 = vunpack.c.l.bf16 %v2542_v29  ;;  %v1171_v15 = vunpack.c.h.bf16 %v2386_v26  ;;  %v2548_v19 = vld [vmem:[#allocation2 + $0x324] sm:$0xff]  ;;  %v2558_v26 = vld [vmem:[#allocation2 + $0x450] sm:$0xff] }
 0x1f7   :  { %962 = vadd.xlane.f32.xlu1 %v961_v50  ;;  %v975_v0 = vadd.f32 %v974_v63, %v973_v13  ;;  %1319 = vmatpush.msra.mxu3 %v1200_v45  ;;  %v2527_v50 = vld [vmem:[#allocation2 + $0x498] sm:$0xff]  ;;  %v1219_v18 = vunpack.c.h.bf16 %v2399_v61  ;;  %v1182_v21 = vunpack.c.l.bf16 %v2548_v19  ;;  %v1260_v20 = vunpack.c.l.bf16 %v2550_v11 }
 0x1f8   :  { %1304 = vmatpush.msra.mxu2 %v1137_v57  ;;  %1365 = vmatpush.msrb.mxu0 %v1278_v32  ;;  %v1275_v31 = vunpack.c.l.bf16 %v2527_v50  ;;  %v2532_v13 = vld [vmem:[#allocation2 + $0x33c] sm:$0xff]  ;;  %v2534_v63 = vld [vmem:[#allocation2 + $0x474] sm:$0xff]  ;;  %v1168_v45 = vunpack.c.h.bf16 %v2392_v34  ;;  %v1216_v57 = vunpack.c.h.bf16 %v2401_v47  ;;  %v1213_v8 = vunpack.c.h.bf16 %v2472_v40  ;;  %v2565_v32 = vld [vmem:[#allocation2 + $0x444] sm:$0xff] }
 0x1f9   :  { %1320 = vmatpush.msra.mxu3 %v1197_v2  ;;  %1332 = vmatpush.msrb.mxu1 %v1269_v53  ;;  %v1266_v49 = vunpack.c.l.bf16 %v2534_v63  ;;  %v2556_v2 = vld [vmem:[#allocation2 + $0x318] sm:$0xff]  ;;  %v1273_v34 = vunpack.c.h.bf16 %v2510_v23  ;;  %v1254_v47 = vunpack.c.l.bf16 %v2565_v32  ;;  %v1270_v53 = vunpack.c.h.bf16 %v2522_v46 }
 0x1fa   :  { %1305 = vmatpush.msra.mxu2 %v1134_v58  ;;  %1366 = vmatpush.msrb.mxu0 %v1275_v31  ;;  %v1179_v61 = vunpack.c.l.bf16 %v2556_v2  ;;  %v1257_v58 = vunpack.c.l.bf16 %v2558_v26  ;;  %v2571_v31 = vld [vmem:[#allocation2 + $0x438] sm:$0xff]  ;;  %v1159_v40 = vunpack.c.h.bf16 %v2418_v59  ;;  %v1207_v23 = vunpack.c.h.bf16 %v2484_v51 }
 0x1fb   :  { %1321 = vmatpush.msra.mxu3 %v1194_v24  ;;  %1333 = vmatpush.msrb.mxu1 %v1266_v49  ;;  %v1165_v24 = vunpack.c.h.bf16 %v2403_v28  ;;  %v1251_v28 = vunpack.c.l.bf16 %v2571_v31  ;;  %v1204_v46 = vunpack.c.h.bf16 %v2490_v55  ;;  %v2583_v49 = vld [vmem:[#allocation2 + $0x420] sm:$0xff]  ;;  %v1153_v51 = vunpack.c.h.bf16 %v2470_v1 }
 0x1fc   :  { %1306 = vmatpush.msra.mxu2 %v1131_v52  ;;  %1371 = vmatpush.msra.mxu0 %v1177_v43  ;;  %v1162_v52 = vunpack.c.h.bf16 %v2414_v16  ;;  %v1267_v43 = vunpack.c.h.bf16 %v2534_v63  ;;  %v1245_v59 = vunpack.c.l.bf16 %v2583_v49  ;;  %v1201_v63 = vunpack.c.h.bf16 %v2496_v62  ;;  %v2598_v62 = vld [vmem:[#allocation2 + $0x3fc] sm:$0xff] }
 0x1fd   :  { %1322 = vmatpush.msra.mxu3 %v1191_v41  ;;  %1334 = vmatpush.msrb.mxu1 %v1263_v35  ;;  %v1210_v41 = vunpack.c.h.bf16 %v2478_v44  ;;  %v1156_v44 = vunpack.c.h.bf16 %v2425_v12  ;;  %v1150_v55 = vunpack.c.h.bf16 %v2476_v9  ;;  %v2595_v35 = vld [vmem:[#allocation2 + $0x408] sm:$0xff]  ;;  %v1195_v9 = vunpack.c.h.bf16 %v2508_v56 }
 0x1fe   :  { %1391 = vmatpush.msrb.mxu2 %v1225_v39  ;;  %1372 = vmatpush.msra.mxu0 %v1174_v7  ;;  %v2577_v39 = vld [vmem:[#allocation2 + $0x42c] sm:$0xff]  ;;  %v1261_v7 = vunpack.c.h.bf16 %v2550_v11  ;;  %v1239_v1 = vunpack.c.l.bf16 %v2595_v35  ;;  %v1144_v11 = vunpack.c.h.bf16 %v2488_v17  ;;  %v1189_v56 = vunpack.c.h.bf16 %v2532_v13 }
 0x1ff   :  { %976 = vadd.xlane.f32.xlu1 %v975_v0  ;;  %v1188_v0 = vunpack.c.l.bf16 %v2532_v13  ;;  %1335 = vmatpush.msrb.mxu1 %v1260_v20  ;;  %v1248_v16 = vunpack.c.l.bf16 %v2577_v39  ;;  %v1252_v20 = vunpack.c.h.bf16 %v2571_v31  ;;  %v1183_v13 = vunpack.c.h.bf16 %v2548_v19 }
 0x200   :  { %1392 = vmatpush.msrb.mxu2 %v1222_v6  ;;  %1373 = vmatpush.msra.mxu0 %v1171_v15  ;;  %v2589_v6 = vld [vmem:[#allocation2 + $0x414] sm:$0xff]  ;;  %v1147_v15 = vunpack.c.h.bf16 %v2482_v10  ;;  %v1141_v10 = vunpack.c.h.bf16 %v2494_v14  ;;  %v1135_v14 = vunpack.c.h.bf16 %v2506_v33  ;;  %v1240_v33 = vunpack.c.h.bf16 %v2595_v35 }
 0x201   :  { %1323 = vmatpush.msra.mxu3 %v1188_v0  ;;  %1336 = vmatpush.msrb.mxu1 %v1257_v58  ;;  %v1264_v0 = vunpack.c.h.bf16 %v2542_v29  ;;  %v1242_v12 = vunpack.c.l.bf16 %v2589_v6  ;;  %v1198_v29 = vunpack.c.h.bf16 %v2502_v25  ;;  %v1255_v25 = vunpack.c.h.bf16 %v2565_v32  ;;  %v1097_v58 = vld [vmem:[#allocation2 + $0x3e4] sm:$0xff] }
 0x202   :  { %1393 = vmatpush.msrb.mxu2 %v1219_v18  ;;  %1374 = vmatpush.msra.mxu0 %v1168_v45  ;;  %v1236_v18 = vunpack.c.l.bf16 %v2598_v62  ;;  %v1099_v45 = vld [vmem:[#allocation2 + $0x3f0] sm:$0xff]  ;;  %v1230_v17 = vunpack.c.l.bf16 %v1097_v58  ;;  %v1276_v19 = vunpack.c.h.bf16 %v2527_v50  ;;  %v1231_v50 = vunpack.c.h.bf16 %v1097_v58 }
 0x203   :  { %1324 = vmatpush.msra.mxu3 %v1185_v38  ;;  %1337 = vmatpush.msrb.mxu1 %v1254_v47  ;;  %v1258_v38 = vunpack.c.h.bf16 %v2558_v26  ;;  %v1233_v26 = vunpack.c.l.bf16 %v1099_v45  ;;  %v1126_v58 = vld [vmem:[#allocation2 + $0x494] sm:$0xf] }
 0x204   :  { %1394 = vmatpush.msrb.mxu2 %v1216_v57  ;;  %1375 = vmatpush.msra.mxu0 %v1165_v24  ;;  %v1095_v24 = vld [vmem:[#allocation2 + $0x3d8] sm:$0xff] }
 0x205   :  { %1325 = vmatpush.msra.mxu3 %v1182_v21  ;;  %1338 = vmatpush.msrb.mxu1 %v1251_v28  ;;  %v1192_v21 = vunpack.c.h.bf16 %v2520_v5  ;;  %v1138_v5 = vunpack.c.h.bf16 %v2500_v27  ;;  %v1227_v32 = vunpack.c.l.bf16 %v1095_v24  ;;  %v1279_v27 = vunpack.c.h.bf16 %v2515_v36 }
 0x206   :  { %1395 = vmatpush.msrb.mxu2 %v1213_v8  ;;  %1376 = vmatpush.msra.mxu0 %v1162_v52  ;;  %v1186_v8 = vunpack.c.h.bf16 %v2540_v54  ;;  %v1243_v52 = vunpack.c.h.bf16 %v2589_v6  ;;  %v1132_v54 = vunpack.c.h.bf16 %v2518_v3  ;;  %v1237_v3 = vunpack.c.h.bf16 %v2598_v62 }
 0x207   :  { %1326 = vmatpush.msra.mxu3 %v1179_v61  ;;  %1339 = vmatpush.msrb.mxu1 %v1248_v16  ;;  %v1249_v61 = vunpack.c.h.bf16 %v2577_v39 }
 0x208   :  { %1396 = vmatpush.msrb.mxu2 %v1210_v41  ;;  %1377 = vmatpush.msra.mxu0 %v1159_v40  ;;  %v1180_v41 = vunpack.c.h.bf16 %v2556_v2  ;;  %v1234_v40 = vunpack.c.h.bf16 %v1099_v45 }
 0x209   :  { %1411 = vmatpush.msrb.mxu3 %v1273_v34  ;;  %1340 = vmatpush.msrb.mxu1 %v1245_v59  ;;  %v1246_v34 = vunpack.c.h.bf16 %v2583_v49  ;;  %v1805_v49 = vld [vmem:[%s2830_s8 + $0x5] ss:$8 sm:$0xf] }
 0x20a   :  { %1397 = vmatpush.msrb.mxu2 %v1207_v23  ;;  %1378 = vmatpush.msra.mxu0 %v1156_v44  ;;  %v1228_v23 = vunpack.c.h.bf16 %v1095_v24  ;;  %v1804_v44 = vld [vmem:[%s2830_s8 + $0x4] ss:$8 sm:$0xf]  ;;  %v1015_v35 = vperm.slane %v1805_v49, 1 }
 0x20b   :  { %1412 = vmatpush.msrb.mxu3 %v1270_v53  ;;  %1341 = vmatpush.msrb.mxu1 %v1242_v12  ;;  %v996_v59 = vperm.slane %v1804_v44, 3  ;;  %v1130_v24 = vld [vmem:[#allocation2 + $0x4ac] sm:$0xf] }
 0x20c   :  { %1398 = vmatpush.msrb.mxu2 %v1204_v46  ;;  %1379 = vmatpush.msra.mxu0 %v1153_v51  ;;  %v993_v51 = vperm.slane %v1804_v44, 0 }
 0x20d   :  { %1413 = vmatpush.msrb.mxu3 %v1267_v43  ;;  %1342 = vmatpush.msrb.mxu1 %v1239_v1 }
 0x20e   :  { %1399 = vmatpush.msrb.mxu2 %v1201_v63  ;;  %1380 = vmatpush.msra.mxu0 %v1150_v55  ;;  %v994_v63 = vperm.slane %v1804_v44, 1 }
 0x20f   :  { %1414 = vmatpush.msrb.mxu3 %v1264_v0  ;;  %1343 = vmatpush.msrb.mxu1 %v1236_v18 }
 0x210   :  { %1400 = vmatpush.msrb.mxu2 %v1198_v29  ;;  %1381 = vmatpush.msra.mxu0 %v1147_v15  ;;  %v1014_v29 = vperm.slane %v1805_v49, 0  ;;  %v1016_v15 = vperm.slane %v1805_v49, 2 }
 0x211   :  { %1415 = vmatpush.msrb.mxu3 %v1261_v7  ;;  %1344 = vmatpush.msrb.mxu1 %v1233_v26  ;;  %v995_v7 = vperm.slane %v1804_v44, 2  ;;  %v1094_v26 = vld [vmem:[#allocation2 + $0x3d4] sm:$0xf]  ;;  %v1086_v44 = vld [vmem:[#allocation2 + $0x3a4] sm:$0xf] }
 0x212   :  { %1401 = vmatpush.msrb.mxu2 %v1195_v9  ;;  %1382 = vmatpush.msra.mxu0 %v1144_v11  ;;  %v1017_v9 = vperm.slane %v1805_v49, 3  ;;  %v1118_v49 = vld [vmem:[#allocation2 + $0x464] sm:$0xf] }
 0x213   :  { %1416 = vmatpush.msrb.mxu3 %v1258_v38  ;;  %1345 = vmatpush.msrb.mxu1 %v1230_v17 }
 0x214   :  { %1402 = vmatpush.msrb.mxu2 %v1192_v21  ;;  %1383 = vmatpush.msra.mxu0 %v1141_v10 }
 0x215   :  { %1417 = vmatpush.msrb.mxu3 %v1255_v25  ;;  %1346 = vmatpush.msrb.mxu1 %v1227_v32 }
 0x216   :  { %1403 = vmatpush.msrb.mxu2 %v1189_v56  ;;  %1384 = vmatpush.msra.mxu0 %v1138_v5  ;;  %v1060_v5 = vld [vmem:[#allocation2 + $0x308] sm:$0xf] }
 0x217   :  { %1418 = vmatpush.msrb.mxu3 %v1252_v20  ;;  %1445 = vmatpush.msra.mxu1 %v1279_v27  ;;  %v1274_v27 = vunpack.c.l.bf16 %v1126_v58 }
 0x218   :  { %1404 = vmatpush.msrb.mxu2 %v1186_v8  ;;  %1385 = vmatpush.msra.mxu0 %v1135_v14  ;;  %v1092_v8 = vld [vmem:[#allocation2 + $0x3c8] sm:$0xf] }
 0x219   :  { %1419 = vmatpush.msrb.mxu3 %v1249_v61  ;;  %1446 = vmatpush.msra.mxu1 %v1276_v19  ;;  %v1175_v19 = vunpack.c.l.bf16 %v1060_v5  ;;  %v1042_v5 = vld [vmem:[#allocation2 + $0x29c] sm:$0xf] }
 0x21a   :  { %1405 = vmatpush.msrb.mxu2 %v1183_v13  ;;  %1386 = vmatpush.msra.mxu0 %v1132_v54  ;;  %v1058_v54 = vld [vmem:[#allocation2 + $0x2fc] sm:$0xf] }
 0x21b   :  { %1420 = vmatpush.msrb.mxu3 %v1246_v34  ;;  %v1124_v34 = vld [vmem:[#allocation2 + $0x488] sm:$0xf] }
 0x21c   :  { %1406 = vmatpush.msrb.mxu2 %v1180_v41  ;;  %v1090_v41 = vld [vmem:[#allocation2 + $0x3bc] sm:$0xf] }
 0x21d   :  { %1421 = vmatpush.msrb.mxu3 %v1243_v52  ;;  %v1128_v52 = vld [vmem:[#allocation2 + $0x4a0] sm:$0xf] }
 0x21f   :  { %1422 = vmatpush.msrb.mxu3 %v1240_v33  ;;  %v1280_v33 = vunpack.c.l.bf16 %v1130_v24 }
 0x221   :  { %1423 = vmatpush.msrb.mxu3 %v1237_v3  ;;  %v1088_v3 = vld [vmem:[#allocation2 + $0x3b0] sm:$0xf] }
 0x223   :  { %1424 = vmatpush.msrb.mxu3 %v1234_v40  ;;  %v1172_v40 = vunpack.c.l.bf16 %v1058_v54 }
 0x225   :  { %1425 = vmatpush.msrb.mxu3 %v1231_v50  ;;  %v1220_v50 = vunpack.c.l.bf16 %v1090_v41  ;;  %v1040_v41 = vld [vmem:[#allocation2 + $0x290] sm:$0xf] }
 0x227   :  { %1426 = vmatpush.msrb.mxu3 %v1228_v23  ;;  %v1120_v23 = vld [vmem:[#allocation2 + $0x470] sm:$0xf] }
 0x26a   :  { %v963_v57 = vpop.xlane.xlu1 %962 }
 0x26b   :  { %v2615_v47 = vmul.f32 0.0025, %v963_v57 }
 0x26d   :  { %v979_v31 = vmul.f32 %v2615_v47, %v2615_v47  ;;  %v1008_v6 = vsub.f32 %v2438_v48, %v2615_v47  ;;  %v1005_v55 = vsub.f32 %v2430_v30, %v2615_v47  ;;  %v1006_v38 = vsub.f32 %v2441_v37, %v2615_v47  ;;  %v1062_v30 = vld [vmem:[#allocation2 + $0x314] sm:$0xf] }
 0x26e   :  { %v1007_v62 = vsub.f32 %v2443_v22, %v2615_v47  ;;  %v1178_v17 = vunpack.c.l.bf16 %v1062_v30  ;;  %v1226_v22 = vunpack.c.l.bf16 %v1094_v26 }
 0x272   :  { %v977_v53 = vpop.xlane.xlu1 %976 }
 0x273   :  { %v978_v28 = vmul.f32 0.0025, %v977_v53  ;;  %v1223_v53 = vunpack.c.l.bf16 %v1092_v8  ;;  %v1106_v8 = vld [vmem:[#allocation2 + $0x41c] sm:$0xf] }
 0x275   :  { %v980_v36 = vsub.f32 %v978_v28, %v979_v31  ;;  %v1122_v31 = vld [vmem:[#allocation2 + $0x47c] sm:$0xf]  ;;  %v1271_v28 = vunpack.c.l.bf16 %v1124_v34 }
 0x277   :  { %v981_v2 = vadd.f32 1e-05, %v980_v36  ;;  %v1056_v36 = vld [vmem:[#allocation2 + $0x2f0] sm:$0xf] }
 0x279   :  { %1934 = vrsqrt.f32 %v981_v2  ;;  %vm988_vm11 = vweird.f32 %v981_v2 }
 0x27f   :  { %v1935_v43 = vpop.eup %1934 }
 0x280   :  { %v983_v39 = vmul.f32 %v1935_v43, %v981_v2  ;;  %vm989_vm10 = vweird.f32 %v1935_v43  ;;  %v1277_v2 = vunpack.c.l.bf16 %v1128_v52 }
 0x281   :  { %vm990_vm12 = vmor %vm988_vm11, %vm989_vm10 }
 0x282   :  { %v984_v16 = vmul.f32 %v1935_v43, %v983_v39  ;;  %v1169_v39 = vunpack.c.l.bf16 %v1056_v36  ;;  %v1038_v36 = vld [vmem:[#allocation2 + $0x284] sm:$0xf] }
 0x284   :  { %v985_v46 = vmul.f32 0.5, %v984_v16  ;;  %v1217_v16 = vunpack.c.l.bf16 %v1088_v3  ;;  %v1102_v3 = vld [vmem:[#allocation2 + $0x404] sm:$0xf] }
 0x286   :  { %v986_v0 = vsub.f32 1.5, %v985_v46  ;;  %v1265_v46 = vunpack.c.l.bf16 %v1120_v23 }
 0x288   :  { %v987_v12 = vmul.f32 %v1935_v43, %v986_v0  ;;  %v1054_v0 = vld [vmem:[#allocation2 + $0x2e4] sm:$0xf] }
 0x28a   :  { %v991_v1 = vsel %vm990_vm12, %v1935_v43, %v987_v12  ;;  %v1268_v43 = vunpack.c.l.bf16 %v1122_v31  ;;  %v1262_v12 = vunpack.c.l.bf16 %v1118_v49  ;;  %v1070_v31 = vld [vmem:[#allocation2 + $0x344] sm:$0xf]  ;;  %v1098_v49 = vld [vmem:[#allocation2 + $0x3ec] sm:$0xf] }
 0x28b   :  { %v1004_v25 = vmul.f32 %v996_v59, %v991_v1  ;;  %v1001_v18 = vmul.f32 %v993_v51, %v991_v1  ;;  %v1002_v48 = vmul.f32 %v994_v63, %v991_v1  ;;  %v1003_v11 = vmul.f32 %v995_v7, %v991_v1  ;;  %v1084_v59 = vld [vmem:[#allocation2 + $0x398] sm:$0xf] }
 0x28c   :  { %v1214_v51 = vunpack.c.l.bf16 %v1086_v44  ;;  %v1052_v63 = vld [vmem:[#allocation2 + $0x2d8] sm:$0xf]  ;;  %v1190_v23 = vunpack.c.l.bf16 %v1070_v31  ;;  %v1066_v44 = vld [vmem:[#allocation2 + $0x32c] sm:$0xf] }
 0x28d   :  { %v1009_v21 = vmul.f32 %v1005_v55, %v1001_v18  ;;  %v1010_v20 = vmul.f32 %v1006_v38, %v1002_v48  ;;  %v1011_v45 = vmul.f32 %v1007_v62, %v1003_v11  ;;  %v1012_v57 = vmul.f32 %v1008_v6, %v1004_v25  ;;  %v1116_v7 = vld [vmem:[#allocation2 + $0x458] sm:$0xf]  ;;  %v1082_v55 = vld [vmem:[#allocation2 + $0x38c] sm:$0xf]  ;;  %v1048_v25 = vld [vmem:[#allocation2 + $0x2c0] sm:$0xf] }
 0x28e   :  { %v1166_v6 = vunpack.c.l.bf16 %v1054_v0  ;;  %v1050_v38 = vld [vmem:[#allocation2 + $0x2cc] sm:$0xf]  ;;  %v1163_v1 = vunpack.c.l.bf16 %v1052_v63  ;;  %v1259_v62 = vunpack.c.l.bf16 %v1116_v7  ;;  %v1112_v18 = vld [vmem:[#allocation2 + $0x440] sm:$0xf]  ;;  %v1157_v30 = vunpack.c.l.bf16 %v1048_v25 }
 0x28f   :  { %v1022_v10 = vadd.f32 %v1014_v29, %v1009_v21  ;;  %v1023_v56 = vadd.f32 %v1015_v35, %v1010_v20  ;;  %v1024_v37 = vadd.f32 %v1016_v15, %v1011_v45  ;;  %v1025_v61 = vadd.f32 %v1017_v9, %v1012_v57  ;;  %v1114_v35 = vld [vmem:[#allocation2 + $0x44c] sm:$0xf]  ;;  %v1080_v15 = vld [vmem:[#allocation2 + $0x380] sm:$0xf]  ;;  %v1078_v21 = vld [vmem:[#allocation2 + $0x374] sm:$0xf] }
 0x290   :  { %v1211_v29 = vunpack.c.l.bf16 %v1084_v59  ;;  %v1208_v9 = vunpack.c.l.bf16 %v1082_v55  ;;  %v1160_v48 = vunpack.c.l.bf16 %v1050_v38  ;;  %v1256_v11 = vunpack.c.l.bf16 %v1114_v35  ;;  %v1046_v45 = vld [vmem:[#allocation2 + $0x2b4] sm:$0xf]  ;;  %v1034_v0 = vld [vmem:[#allocation2 + $0x26c] sm:$0xf]  ;;  %v1064_v63 = vld [vmem:[#allocation2 + $0x320] sm:$0xf] }
 0x291   :  { %v2640_v32 = vmax.f32 %v1022_v10, 0.0  ;;  %v2642_v14 = vmax.f32 %v1023_v56, 0.0  ;;  %v2644_v13 = vmax.f32 %v1024_v37, 0.0  ;;  %v2646_v47 = vmax.f32 %v1025_v61, 0.0  ;;  %v1110_v57 = vld [vmem:[#allocation2 + $0x434] sm:$0xf] }
 0x292   :  { %v1205_v20 = vunpack.c.l.bf16 %v1080_v15  ;;  %v1253_v26 = vunpack.c.l.bf16 %v1112_v18  ;;  %v1076_v10 = vld [vmem:[#allocation2 + $0x368] sm:$0xf]  ;;  %v1202_v56 = vunpack.c.l.bf16 %v1078_v21  ;;  %v1154_v58 = vunpack.c.l.bf16 %v1046_v45 }
 0x293   :  { %1307 = vmatmul.f32.vlgmr.msra.gmra.mxu2 %v2640_v32  ;;  %1327 = vmatmul.f32.vlgmr.msra.gmra.mxu3 %v2642_v14  ;;  %v1044_v37 = vld [vmem:[#allocation2 + $0x2a8] sm:$0xf]  ;;  %v1250_v24 = vunpack.c.l.bf16 %v1110_v57  ;;  %v1184_v7 = vunpack.c.l.bf16 %v1066_v44  ;;  %v1136_v55 = vunpack.c.l.bf16 %v1034_v0  ;;  %v1181_v38 = vunpack.c.l.bf16 %v1064_v63  ;;  %v1918_v0 = vld [vmem:[%s2828_s6 + $0x78] sm:$0xff]  }
 0x294   :  { %1347 = vmatmul.f32.vlgmr.msrb.gmra.mxu1 %v2644_v13  ;;  %1826 = vmatmul.msk.f32.vlgmr.msrb.gmra.mxu0 %vm536_vm6, %v2646_v47  ;;  %v1108_v61 = vld [vmem:[#allocation2 + $0x428] sm:$0xf]  ;;  %v1151_v34 = vunpack.c.l.bf16 %v1044_v37  ;;  %v1997_v18 = vmov 0   ;;  %v1895_v63 = vunpack.c.h.bf16 %v1918_v0 }
 0x295   :  { %1451 = vmatpush.msrb.mxu1 %v1178_v17  ;;  %1471 = vmatpush.msrb.mxu0 %v1226_v22  ;;  %v1074_v17 = vld [vmem:[#allocation2 + $0x35c] sm:$0xf]  ;;  %v1199_v22 = vunpack.c.l.bf16 %v1076_v10  ;;  %v1247_v52 = vunpack.c.l.bf16 %v1108_v61  ;;  %v1808_v25 = vld [vmem:[%s2831_s9 + $0x3] ss:$8 sm:$0x7] }
 0x296   :  { %1491 = vmatpush.msra.mxu2 %v1274_v27  ;;  %1525 = vmatpush.msra.mxu3 %v1280_v33  ;;  %v1072_v27 = vld [vmem:[#allocation2 + $0x350] sm:$0xf]  ;;  %v1196_v54 = vunpack.c.l.bf16 %v1074_v17  ;;  %v1283_v21 = vperm.slane %v1808_v25, 1  ;;  %v1607_v44 = vld [vmem:[%s2829_s7 + $0x8] sm:$0xff] }
 0x297   :  { %1452 = vmatpush.msrb.mxu1 %v1175_v19  ;;  %1472 = vmatpush.msrb.mxu0 %v1223_v53  ;;  %v1104_v33 = vld [vmem:[#allocation2 + $0x410] sm:$0xf]  ;;  %v1148_v19 = vunpack.c.l.bf16 %v1042_v5  ;;  %v1244_v53 = vunpack.c.l.bf16 %v1106_v8 }
 0x298   :  { %1492 = vmatpush.msra.mxu2 %v1271_v28  ;;  %1526 = vmatpush.msra.mxu3 %v1277_v2  ;;  %v1193_v28 = vunpack.c.l.bf16 %v1072_v27  ;;  %v1145_v2 = vunpack.c.l.bf16 %v1040_v41 }
 0x299   :  { %1453 = vmatpush.msrb.mxu1 %v1172_v40  ;;  %1473 = vmatpush.msrb.mxu0 %v1220_v50  ;;  %v1241_v40 = vunpack.c.l.bf16 %v1104_v33  ;;  %v1068_v50 = vld [vmem:[#allocation2 + $0x338] sm:$0xf] }
 0x29a   :  { %1493 = vmatpush.msra.mxu2 %v1268_v43  ;;  %v1100_v43 = vld [vmem:[#allocation2 + $0x3f8] sm:$0xf]  ;;  %1926 = vset.pattern.permute.xlu2 %v1997_v18 }
 0x29b   :  { %1454 = vmatpush.msrb.mxu1 %v1169_v39  ;;  %1474 = vmatpush.msrb.mxu0 %v1217_v16  ;;  %v1142_v39 = vunpack.c.l.bf16 %v1038_v36  ;;  %v1238_v16 = vunpack.c.l.bf16 %v1102_v3 }
 0x29c   :  { %1494 = vmatpush.msra.mxu2 %v1265_v46  ;;  %1387 = vmatmul.f32.vlgmr.msra.gmra.mxu0 %v2640_v32  ;;  %v1187_v46 = vunpack.c.l.bf16 %v1068_v50 }
 0x29d   :  { %1407 = vmatmul.f32.vlgmr.msrb.gmra.mxu2 %v2642_v14  ;;  %1427 = vmatmul.f32.vlgmr.msrb.gmra.mxu3 %v2644_v13 }
 0x29e   :  { %1827 = vmatmul.msk.f32.vlgmr.msra.gmra.mxu1 %vm536_vm6, %v2646_v47  ;;  %1475 = vmatpush.msrb.mxu0 %v1214_v51  ;;  %v1235_v51 = vunpack.c.l.bf16 %v1100_v43  ;;  %v1595_v43 = vld [vmem:[%s2824_s2] sm:$0x3]  ;;  %s1789_s2 = sshll.u32 %s1998_s5, 4  ;;  %s1790_s2 = int_to_ptr.vmem [resolvable:$true] %s1789_s2 }
 0x29f   :  { %1455 = vmatpush.msrb.mxu1 %v1166_v6  ;;  %1495 = vmatpush.msra.mxu2 %v1262_v12  ;;  %v1032_v6 = vld [vmem:[#allocation2 + $0x260] sm:$0xf] }
 0x2a0   :  { %1476 = vmatpush.msrb.mxu0 %v1211_v29  ;;  %v1096_v12 = vld [vmem:[#allocation2 + $0x3e0] sm:$0xf]  ;;  %v1232_v29 = vunpack.c.l.bf16 %v1098_v49  ;;  %v1133_v35 = vunpack.c.l.bf16 %v1032_v6  ;;  %1927 = vset.pattern.permute.xlu0 %v1997_v18  ;;  %v1916_v18 = vld [vmem:[%s2828_s6 + $0x68] sm:$0xff]  }
 0x2a1   :  { %1456 = vmatpush.msrb.mxu1 %v1163_v1  ;;  %1496 = vmatpush.msra.mxu2 %v1259_v62  ;;  %v1229_v1 = vunpack.c.l.bf16 %v1096_v12  ;;  %v1894_v12 = vunpack.c.l.bf16 %v1918_v0  ;;  %v1911_v0 = vld [vmem:[%s2828_s6 + $0x40] sm:$0xff]  }
 0x2a2   :  { %1477 = vmatpush.msrb.mxu0 %v1208_v9 }
 0x2a3   :  { %1457 = vmatpush.msrb.mxu1 %v1160_v48  ;;  %1497 = vmatpush.msra.mxu2 %v1256_v11  ;;  %v1282_v11 = vperm.slane %v1808_v25, 0 }
 0x2a4   :  { %1478 = vmatpush.msrb.mxu0 %v1205_v20 }
 0x2a5   :  { %1458 = vmatpush.msrb.mxu1 %v1157_v30  ;;  %1498 = vmatpush.msra.mxu2 %v1253_v26 }
 0x2a6   :  { %1479 = vmatpush.msrb.mxu0 %v1202_v56  ;;  %1828 = vmatmul.msk.f32.vlgmr.msra.gmra.mxu3 %vm536_vm6, %v2646_v47  ;;  %v1036_v47 = vld [vmem:[#allocation2 + $0x278] sm:$0xf]  ;;  %v1284_v56 = vperm.slane %v1808_v25, 2  ;;  %v1908_v25 = vld [vmem:[%s2828_s6 + $0x28] sm:$0xff]  }
 0x2a7   :  { %1459 = vmatpush.msrb.mxu1 %v1154_v58  ;;  %1499 = vmatpush.msra.mxu2 %v1250_v24  ;;  %v1139_v59 = vunpack.c.l.bf16 %v1036_v47 }
 0x2a8   :  { %1480 = vmatpush.msrb.mxu0 %v1199_v22 }
 0x2a9   :  { %1460 = vmatpush.msrb.mxu1 %v1151_v34  ;;  %1500 = vmatpush.msra.mxu2 %v1247_v52  ;;  %v1609_v52 = vld [vmem:[%s2829_s7 + $0x18] sm:$0xff] }
 0x2aa   :  { %1481 = vmatpush.msrb.mxu0 %v1196_v54  ;;  %1626 = vmatpush.msrb.mxu3 %v1609_v52 }
 0x2ab   :  { %1461 = vmatpush.msrb.mxu1 %v1148_v19  ;;  %1501 = vmatpush.msra.mxu2 %v1244_v53 }
 0x2ac   :  { %1482 = vmatpush.msrb.mxu0 %v1193_v28 }
 0x2ad   :  { %1462 = vmatpush.msrb.mxu1 %v1145_v2  ;;  %1502 = vmatpush.msra.mxu2 %v1241_v40 }
 0x2ae   :  { %1483 = vmatpush.msrb.mxu0 %v1190_v23 }
 0x2af   :  { %1463 = vmatpush.msrb.mxu1 %v1142_v39  ;;  %1503 = vmatpush.msra.mxu2 %v1238_v16  ;;  %v1608_v39 = vld [vmem:[%s2829_s7 + $0x10] sm:$0xff]  ;;  %v787_v16 = vpop.xlane.xlu2 %786 }
 0x2b0   :  { %1484 = vmatpush.msrb.mxu0 %v1187_v46  ;;  %1627 = vmatpush.msrb.mxu3 %v1608_v39  ;;  %v1910_v46 = vld [vmem:[%s2828_s6 + $0x38] sm:$0xff]   ;;  %v2705_v49 = vmul.f32 0.0033333334, %v787_v16 }
 0x2b1   :  { %1464 = vmatpush.msrb.mxu1 %v1139_v59  ;;  %1504 = vmatpush.msra.mxu2 %v1235_v51  ;;  %v1606_v59 = vld [vmem:[%s2829_s7] sm:$0xff]  ;;  %v1863_v51 = vunpack.c.h.bf16 %v1910_v46  ;;  %v1862_v6 = vunpack.c.l.bf16 %v1910_v46 }
 0x2b2   :  { %1485 = vmatpush.msrb.mxu0 %v1184_v7  ;;  %1628 = vmatpush.msrb.mxu3 %v1607_v44  ;;  %v798_v7 = vpop.xlane.xlu0 %797  ;;  %v1833_v46 = vld [vmem:[%s2828_s6] sm:$0xff]  }
 0x2b3   :  { %1465 = vmatpush.msrb.mxu1 %v1136_v55  ;;  %1505 = vmatpush.msra.mxu2 %v1232_v29  ;;  %v1909_v55 = vld [vmem:[%s2828_s6 + $0x30] sm:$0xff]  }
 0x2b4   :  { %1486 = vmatpush.msrb.mxu0 %v1181_v38  ;;  %1629 = vmatpush.msrb.mxu3 %v1606_v59  ;;  %v1917_v29 = vld [vmem:[%s2828_s6 + $0x70] sm:$0xff]   ;;  %v799_v38 = vmul.f32 0.0033333334, %v798_v7  ;;  %v1919_v59 = vld [vmem:[%s2828_s6 + $0x80] sm:$0xff]  }
 0x2b5   :  { %1466 = vmatpush.msrb.mxu1 %v1133_v35  ;;  %1506 = vmatpush.msra.mxu2 %v1229_v1  ;;  %v800_v35 = vmul.f32 %v2705_v49, %v2705_v49  ;;  %v1859_v1 = vunpack.c.h.bf16 %v1909_v55 }
 0x2b6   :  { %1467 = vmatmul.f32.vlgmr.msrb.gmra.mxu1 %v2640_v32  ;;  %1487 = vmatmul.f32.vlgmr.msrb.gmra.mxu0 %v2642_v14 }
 0x2b7   :  { %1507 = vmatmul.f32.vlgmr.msra.gmra.mxu2 %v2644_v13  ;;  %1720 = vmatpush.msra.mxu1 %v1863_v51  ;;  %v1835_v51 = vunpack.c.h.bf16 %v1833_v46 }
 0x2b8   :  { %1740 = vmatpush.msra.mxu3 %v1895_v63  ;;  %v1867_v63 = vunpack.c.h.bf16 %v1911_v0 }
 0x2b9   :  { %1721 = vmatpush.msra.mxu1 %v1862_v6  ;;  %v1899_v6 = vunpack.c.h.bf16 %v1919_v59 }
 0x2ba   :  { %1741 = vmatpush.msra.mxu3 %v1894_v12 }
 0x2bb   :  { %1722 = vmatpush.msra.mxu1 %v1859_v1  ;;  %v1898_v1 = vunpack.c.l.bf16 %v1919_v59 }
 0x311   :  { %v1368_v62 = vpop.f32.mrf.mxu0  ;;  %v1348_v9 = vpop.f32.mrf.mxu1 }
 0x316   :  { %v1308_v15 = vpop.f32.mrf.mxu2  ;;  %v1328_v48 = vpop.f32.mrf.mxu3 }
 0x317   :  { %v1309_v32 = vadd.f32 %v1308_v15, %v1282_v11  ;;  %v1858_v15 = vunpack.c.l.bf16 %v1909_v55  ;;  %v1855_v11 = vunpack.c.h.bf16 %v1908_v25  ;;  %v1834_v55 = vunpack.c.l.bf16 %v1833_v46 }
 0x319   :  { %v1388_v20 = vpop.f32.mrf.mxu0  ;;  %v1329_v13 = vadd.f32 %v1328_v48, %v1309_v32  ;;  %v801_v48 = vsub.f32 %v799_v38, %v800_v35  ;;  %1723 = vmatpush.msra.mxu1 %v1858_v15  ;;  %v1907_v32 = vld [vmem:[%s2828_s6 + $0x20] sm:$0xff]  }
 0x31a   :  { %v1389_v57 = vadd.f32 %v1388_v20, %v1283_v21  ;;  %v1887_v21 = vunpack.c.h.bf16 %v1916_v18  ;;  %v1854_v20 = vunpack.c.l.bf16 %v1908_v25 }
 0x31b   :  { %v1448_v14 = vpop.f32.mrf.mxu1  ;;  %v1349_v37 = vadd.f32 %v1348_v9, %v1329_v13  ;;  %v1890_v9 = vunpack.c.l.bf16 %v1917_v29  ;;  %1724 = vmatpush.msra.mxu1 %v1855_v11 }
 0x31d   :  { %v2668_v17 = vadd.f32 %v1368_v62, %v1349_v37  ;;  %v1891_v62 = vunpack.c.h.bf16 %v1917_v29  ;;  %1725 = vmatpush.msra.mxu1 %v1854_v20  ;;  %v1914_v37 = vld [vmem:[%s2828_s6 + $0x58] sm:$0xff]   ;;  %v1866_v29 = vunpack.c.l.bf16 %v1911_v0 }
 0x31f   :  { %v1539_v41 = vmul.f32 %v2668_v17, %v2668_v17  ;;  %v1531_v53 = vsel %vm202_vm1, %v2668_v17, 0.0  ;;  %1742 = vmatpush.msra.mxu3 %v1891_v62 }
 0x320   :  { %v1408_v45 = vpop.f32.mrf.mxu2  ;;  %v1428_v26 = vpop.f32.mrf.mxu3 }
 0x321   :  { %v1409_v30 = vadd.f32 %v1408_v45, %v1389_v57  ;;  %v1542_v2 = vsel %vm202_vm1, %v1539_v41, 0.0  ;;  %1743 = vmatpush.msra.mxu3 %v1890_v9  ;;  %v1886_v45 = vunpack.c.l.bf16 %v1916_v18  ;;  %v1915_v57 = vld [vmem:[%s2828_s6 + $0x60] sm:$0xff]  }
 0x322   :  { %v1883_v13 = vunpack.c.h.bf16 %v1915_v57  ;;  %v1928_v9 = vld [vmem:[%s2832_s10] ss:$0 sm:$0xff] }
 0x323   :  { %v1429_v10 = vadd.f32 %v1428_v26, %v1409_v30  ;;  %1744 = vmatpush.msra.mxu3 %v1887_v21  ;;  %v1851_v30 = vunpack.c.h.bf16 %v1907_v32  ;;  %v1850_v26 = vunpack.c.l.bf16 %v1907_v32 }
 0x325   :  { %v2666_v58 = vadd.f32 %v1448_v14, %v1429_v10  ;;  %v2730_v14 = vadd.f32 1e-05, %v801_v48  ;;  %1745 = vmatpush.msra.mxu3 %v1886_v45  ;;  %1726 = vmatpush.msra.mxu1 %v1851_v30  ;;  %v1882_v10 = vunpack.c.l.bf16 %v1915_v57  ;;  %v1929_v48 = vld [vmem:[%s2832_s10 + $0x1] ss:$0 sm:$0xff] }
 0x326   :  { %v1806_v30 = vld [vmem:[%s2831_s9 + $0x1] ss:$8 sm:$0x7] }
 0x327   :  { %v1540_v8 = vmul.f32 %v2666_v58, %v2666_v58  ;;  %v1532_v54 = vsel %vm202_vm1, %v2666_v58, 0.0  ;;  %1746 = vmatpush.msra.mxu3 %v1883_v13  ;;  %1936 = vrsqrt.f32 %v2730_v14  ;;  %1727 = vmatpush.msra.mxu1 %v1850_v26  ;;  %vm809_vm15 = vweird.f32 %v2730_v14 }
 0x328   :  { %v1533_v28 = vadd.f32 %v1532_v54, %v1531_v53  ;;  %v1672_v54 = vld [vmem:[%s2828_s6 + $0x94] sm:$0x3] }
 0x329   :  { %v1528_v33 = vpop.f32.mrf.mxu3  ;;  %v1543_v31 = vsel %vm202_vm1, %v1540_v8, 0.0  ;;  %1747 = vmatpush.msra.mxu3 %v1882_v10  ;;  %v1905_v8 = vld [vmem:[%s2828_s6 + $0x10] sm:$0xff]   ;;  %v1710_v41 = vunpack.c.l.bf16 %v1672_v54  ;;  %v814_v10 = vperm.slane %v1806_v30, 0  ;;  %v824_v54 = vsub.f32 %v2406_v60, %v2705_v49 }
 0x32a   :  { %v1544_v50 = vadd.f32 %v1543_v31, %v1542_v2  ;;  %v1843_v52 = vunpack.c.h.bf16 %v1905_v8  ;;  %v1842_v31 = vunpack.c.l.bf16 %v1905_v8  ;;  %v1912_v2 = vld [vmem:[%s2828_s6 + $0x48] sm:$0xff]  }
 0x32b   :  { %1830 = vmatpush.msk.msra.mxu0 %vm1716_vm13, %v1710_v41  ;;  %v1870_v16 = vunpack.c.l.bf16 %v1912_v2 }
 0x32d   :  { %v2751_v53 = vpop.eup %1936 }
 0x32e   :  { %vm810_vm14 = vweird.f32 %v2751_v53 }
 0x32f   :  { %vm811_vm1 = vmor %vm809_vm15, %vm810_vm14 }
 0x333   :  { %v1468_v61 = vpop.f32.mrf.mxu1  ;;  %v1488_v22 = vpop.f32.mrf.mxu0 }
 0x334   :  { %v1469_v24 = vadd.f32 %v1468_v61, %v1284_v56  ;;  %v1906_v56 = vld [vmem:[%s2828_s6 + $0x18] sm:$0xff]  }
 0x335   :  { %v1847_v61 = vunpack.c.h.bf16 %v1906_v56 }
 0x336   :  { %v1489_v5 = vadd.f32 %v1488_v22, %v1469_v24  ;;  %v1879_v24 = vunpack.c.h.bf16 %v1914_v37  ;;  %v1846_v22 = vunpack.c.l.bf16 %v1906_v56  ;;  %v815_v56 = vperm.slane %v1806_v30, 1 }
 0x337   :  { %1728 = vmatpush.msra.mxu1 %v1847_v61  ;;  %v816_v61 = vperm.slane %v1806_v30, 2 }
 0x338   :  { %1748 = vmatpush.msra.mxu3 %v1879_v24 }
 0x339   :  { %1729 = vmatpush.msra.mxu1 %v1846_v22 }
 0x33a   :  { %v1508_v34 = vpop.f32.mrf.mxu2 }
 0x33b   :  { %v1509_v27 = vadd.f32 %v1508_v34, %v1489_v5  ;;  %v1878_v5 = vunpack.c.l.bf16 %v1914_v37  ;;  %v1913_v34 = vld [vmem:[%s2828_s6 + $0x50] sm:$0xff]   ;;  %1730 = vmatpush.msra.mxu1 %v1843_v52 }
 0x33c   :  { %v1809_v52 = vld [vmem:[%s2831_s9 + $0x4] ss:$8 sm:$0x7] }
 0x33d   :  { %v2679_v19 = vadd.f32 %v1528_v33, %v1509_v27  ;;  %1749 = vmatpush.msra.mxu3 %v1878_v5  ;;  %v1875_v27 = vunpack.c.h.bf16 %v1913_v34  ;;  %v1671_v33 = vld [vmem:[%s2828_s6 + $0x90] sm:$0xf]  ;;  %1731 = vmatpush.msra.mxu1 %v1842_v31  ;;  %v1810_v31 = vld [vmem:[%s2831_s9 + $0x5] ss:$8 sm:$0x7] }
 0x33e   :  { %v1807_v5 = vld [vmem:[%s2831_s9 + $0x2] ss:$8 sm:$0x7] }
 0x33f   :  { %v1534_v36 = vsel %vm783_vm9, %v2679_v19, 0.0  ;;  %v1541_v3 = vmul.f32 %v2679_v19, %v2679_v19  ;;  %1750 = vmatpush.msra.mxu3 %v1875_v27 }
 0x340   :  { %v1535_v40 = vadd.f32 %v1534_v36, %v1533_v28  ;;  %v1874_v28 = vunpack.c.l.bf16 %v1913_v34  ;;  %v1709_v36 = vunpack.c.l.bf16 %v1671_v33  ;;  %v825_v33 = vsub.f32 %v2432_v42, %v2705_v49 }
 0x341   :  { %v1545_v23 = vsel %vm783_vm9, %v1541_v3, 0.0  ;;  %v1904_v3 = vld [vmem:[%s2828_s6 + $0x8] sm:$0xff]   ;;  %v832_v42 = vperm.slane %v1807_v5, 2 }
 0x342   :  { %1536 = vadd.xlane.f32.xlu2 %v1535_v40  ;;  %v1546_v47 = vadd.f32 %v1545_v23, %v1544_v50  ;;  %v1920_v40 = vld [vmem:[%s2828_s6 + $0x88] sm:$0xff]   ;;  %1751 = vmatpush.msra.mxu3 %v1874_v28  ;;  %v1839_v50 = vunpack.c.h.bf16 %v1904_v3  ;;  %v1871_v23 = vunpack.c.h.bf16 %v1912_v2  ;;  %v1838_v39 = vunpack.c.l.bf16 %v1904_v3 }
 0x343   :  { %1771 = vmatpush.msra.mxu0 %v1709_v36  ;;  %v1902_v44 = vunpack.c.l.bf16 %v1920_v40  ;;  %v830_v28 = vperm.slane %v1807_v5, 0  ;;  %v1564_v36 = vperm.slane %v1809_v52, 0  ;;  %v1565_v3 = vperm.slane %v1809_v52, 1 }
 0x344   :  { %1547 = vadd.xlane.f32.xlu1 %v1546_v47  ;;  %v1903_v47 = vunpack.c.h.bf16 %v1920_v40  ;;  %1732 = vmatpush.msra.mxu1 %v1839_v50  ;;  %v1566_v2 = vperm.slane %v1809_v52, 2  ;;  %v831_v40 = vperm.slane %v1807_v5, 1 }
 0x345   :  { %1752 = vmatpush.msra.mxu3 %v1871_v23 }
 0x346   :  { %1772 = vmatpush.msra.mxu0 %v1903_v47  ;;  %1733 = vmatpush.msra.mxu1 %v1838_v39  ;;  %v1580_v47 = vperm.slane %v1810_v31, 0 }
 0x347   :  { %1753 = vmatpush.msra.mxu3 %v1870_v16 }
 0x348   :  { %1773 = vmatpush.msra.mxu0 %v1902_v44  ;;  %1734 = vmatpush.msra.mxu1 %v1835_v51  ;;  %v1582_v51 = vperm.slane %v1810_v31, 2 }
 0x349   :  { %1754 = vmatpush.msra.mxu3 %v1867_v63 }
 0x34a   :  { %1774 = vmatpush.msra.mxu0 %v1899_v6  ;;  %1735 = vmatpush.msra.mxu1 %v1834_v55 }
 0x34b   :  { %1755 = vmatpush.msra.mxu3 %v1866_v29 }
 0x34c   :  { %1775 = vmatpush.msra.mxu0 %v1898_v1 }
 0x35a   :  { %1598 = vperm.xlu2 %1926, %v1595_v43   ;;  %v804_v43 = vmul.f32 %v2751_v53, %v2730_v14  ;;  %v823_v14 = vsub.f32 %v2412_v4, %v2705_v49 }
 0x35c   :  { %v805_v38 = vmul.f32 %v2751_v53, %v804_v43  ;;  %v1581_v43 = vperm.slane %v1810_v31, 1 }
 0x35e   :  { %v806_v25 = vmul.f32 0.5, %v805_v38 }
 0x360   :  { %v807_v45 = vsub.f32 1.5, %v806_v25 }
 0x362   :  { %v808_v13 = vmul.f32 %v2751_v53, %v807_v45 }
 0x364   :  { %v812_v24 = vsel %vm811_vm1, %v2751_v53, %v808_v13 }
 0x365   :  { %v820_v8 = vmul.f32 %v814_v10, %v812_v24  ;;  %v821_v34 = vmul.f32 %v815_v56, %v812_v24  ;;  %v822_v41 = vmul.f32 %v816_v61, %v812_v24 }
 0x367   :  { %v826_v4 = vmul.f32 %v823_v14, %v820_v8  ;;  %v827_v23 = vmul.f32 %v824_v54, %v821_v34  ;;  %v828_v60 = vmul.f32 %v825_v33, %v822_v41 }
 0x369   :  { %v836_v63 = vadd.f32 %v830_v28, %v826_v4  ;;  %v838_v38 = vadd.f32 %v832_v42, %v828_v60 }
 0x36b   :  { %v841_v25 = vmax.f32 %v838_v38, 0.0 }
 0x3b5   :  { %v1537_v7 = vpop.xlane.xlu2 %1536 }
 0x3b6   :  { %v2773_v12 = vmul.f32 0.0033333334, %v1537_v7  ;;  %v837_v7 = vadd.f32 %v831_v40, %v827_v23 }
 0x3b7   :  { %v1548_v35 = vpop.xlane.xlu1 %1547 }
 0x3b8   :  { %v1549_v62 = vmul.f32 0.0033333334, %v1548_v35  ;;  %v1550_v15 = vmul.f32 %v2773_v12, %v2773_v12  ;;  %v1573_v49 = vsub.f32 %v2668_v17, %v2773_v12  ;;  %v1574_v39 = vsub.f32 %v2666_v58, %v2773_v12 }
 0x3b9   :  { %v1575_v16 = vsub.f32 %v2679_v19, %v2773_v12 }
 0x3ba   :  { %v1551_v18 = vsub.f32 %v1549_v62, %v1550_v15  ;;  %v839_v62 = vmax.f32 %v836_v63, 0.0  ;;  %v840_v15 = vmax.f32 %v837_v7, 0.0 }
 0x3bc   :  { %v1552_v11 = vadd.f32 1e-05, %v1551_v18 }
 0x3bd   :  { %v1599_v21 = vpop.permute.xlu2 %1598 }
 0x3be   :  { %v1602_v20 = vmul.f32 %v1928_v9, %v1599_v21  ;;  %1938 = vrsqrt.f32 %v1552_v11  ;;  %vm1559_vm2 = vweird.f32 %v1552_v11  ;;  %v1930_v21 = vld [vmem:[%s2833_s11 + $0x1] ss:$0 sm:$0xff] }
 0x3c0   :  { %v1604_v32 = vadd.f32 %v1929_v48, %v1602_v20  ;;  %v1931_v20 = vld [vmem:[%s2833_s11] ss:$0 sm:$0xff] }
 0x3c2   :  { %v1605_v57 = vmax.f32 %v1604_v32, 0.0 }
 0x3c4   :  { %1829 = vmatmul.msk.f32.vlgmr.msrb.gmra.mxu3 %vm118_vm0, %v1605_v57  ;;  %v1939_v26 = vpop.eup %1938 }
 0x3c5   :  { %v1554_v37 = vmul.f32 %v1939_v26, %v1552_v11  ;;  %vm1560_vm0 = vweird.f32 %v1939_v26 }
 0x3c6   :  { %vm1561_vm3 = vmor %vm1559_vm2, %vm1560_vm0 }
 0x3c7   :  { %v1555_v22 = vmul.f32 %v1939_v26, %v1554_v37 }
 0x3c9   :  { %v1556_v27 = vmul.f32 0.5, %v1555_v22 }
 0x3cb   :  { %v1557_v53 = vsub.f32 1.5, %v1556_v27 }
 0x3cd   :  { %v1558_v50 = vmul.f32 %v1939_v26, %v1557_v53 }
 0x3cf   :  { %v1562_v44 = vsel %vm1561_vm3, %v1939_v26, %v1558_v50 }
 0x3d0   :  { %v1570_v46 = vmul.f32 %v1564_v36, %v1562_v44  ;;  %v1571_v0 = vmul.f32 %v1565_v3, %v1562_v44  ;;  %v1572_v59 = vmul.f32 %v1566_v2, %v1562_v44 }
 0x3d2   :  { %v1578_v6 = vmul.f32 %v1575_v16, %v1572_v59  ;;  %v1576_v55 = vmul.f32 %v1573_v49, %v1570_v46  ;;  %v1577_v29 = vmul.f32 %v1574_v39, %v1571_v0 }
 0x3d4   :  { %v1586_v35 = vadd.f32 %v1580_v47, %v1576_v55  ;;  %v1587_v1 = vadd.f32 %v1581_v43, %v1577_v29  ;;  %v1588_v17 = vadd.f32 %v1582_v51, %v1578_v6 }
 0x3d6   :  { %v1589_v58 = vmax.f32 %v1586_v35, 0.0  ;;  %v1590_v9 = vmax.f32 %v1587_v1, 0.0  ;;  %v1591_v19 = vmax.f32 %v1588_v17, 0.0 }
 0x3d8   :  { %v1592_v12 = vadd.f32 %v1589_v58, %v839_v62  ;;  %v1593_v18 = vadd.f32 %v1590_v9, %v840_v15  ;;  %v1594_v48 = vadd.f32 %v1591_v19, %v841_v25 }
 0x3da   :  { %1736 = vmatmul.f32.vlgmr.msra.gmra.mxu1 %v1592_v12  ;;  %1756 = vmatmul.f32.vlgmr.msra.gmra.mxu3 %v1593_v18 }
 0x3db   :  { %1831 = vmatmul.msk.f32.vlgmr.msra.gmra.mxu0 %vm1712_vm4, %v1594_v48 }
 0x447   :  { %v1631_v11 = vpop.f32.mrf.mxu3 }
 0x448   :  { %v1632_v32 = vadd.f32 %v1930_v21, %v1631_v11 }
 0x44a   :  { %v1634_v10 = vmax.f32 %v1632_v32, 0.0 }
 0x457   :  { %v1737_v45 = vpop.f32.mrf.mxu1 }
 0x458   :  { %v1738_v57 = vadd.f32 %v1931_v20, %v1737_v45  ;;  %v1777_v26 = vpop.f32.mrf.mxu0 }
 0x45d   :  { %v1757_v30 = vpop.f32.mrf.mxu3 }
 0x45e   :  { %v1758_v13 = vadd.f32 %v1757_v30, %v1738_v57 }
 0x460   :  { %v1778_v56 = vadd.f32 %v1777_v26, %v1758_v13 }
 0x462   :  { %v1780_v37 = vadd.f32 %v1778_v56, %v1634_v10 }
 0x464   :  { %1940 = vtanh.f32 %v1780_v37 }
 0x46a   :  { %v1941_v61 = vpop.eup %1940 }
 0x46b   :  { %1783 = vst.msk [vmem:[#allocation5] sm:$0x3] %vm1782_vm5, %v1941_v61 }
 0x46c   :  { %1794 = dma.vmem_to_hbm [thread:$0]  %s1790_s2, 32, %s1792_s1, [#allocation4]  }
 0x46d   :  { %1992 = dma.done.wait [#allocation4], 32  }
 0x46e   :  { %1993 = vsyncadd [#allocation4], 4294967264 }
 0x46f   :  { %1799 = vsyncpa [#allocation3], 1 }
 0x470   :  { %1800 = vsyncpa [#allocation4], 1 }

</bundles_post_ra>
